<compile_context>
chip_gen: v5e
topology: v5e:2x2
jax: 0.10.0
libtpu: 0.0.40
codegen_flags: <defaults>
</compile_context>

<pallas_src>
import math
from functools import partial

import jax
import jax.numpy as jnp
from jax import lax
from jax.experimental import pallas as pl
from jax.experimental.pallas import tpu as pltpu

_LN_EPS = 1e-5
_GELU_C = math.sqrt(2.0 / math.pi)
_NEG_INF = -1e30


def _device_kind():
    try:
        return jax.devices()[0].device_kind.lower()
    except Exception:
        return ""


_KIND = _device_kind()
_IS_V7X = "v7" in _KIND
_BIG_VMEM = ("v5" in _KIND) or ("v6" in _KIND)      # 128 MiB physical VMEM generations
_VMEM_LIMIT = (64 if _BIG_VMEM else 32) * 1024 * 1024
_ROW_TILE = 1024 if _BIG_VMEM else 512


def _cparams(n_axes):
    return pltpu.CompilerParams(
        dimension_semantics=("parallel",) * n_axes,
        vmem_limit_bytes=_VMEM_LIMIT)


def _row_tile_size(m):
    t = min(_ROW_TILE, m)
    # v7x has 2 TensorCores sharded over "parallel" grid axes: avoid single-step grids.
    if _IS_V7X and t == m and m >= 16:
        t = ((m + 15) // 16) * 8            # ceil(m/2) rounded up to a sublane multiple
    return t


# ----------------------------- kernels -----------------------------

def _in_embed_kernel(x_ref, w_ref, b_ref, wpe_ref, o_ref):
    # y = prompt @ W_in + b_in + wpe  (positional add fused into the epilogue)
    x = x_ref[0].astype(jnp.bfloat16)
    y = jnp.dot(x, w_ref[...], preferred_element_type=jnp.float32)
    o_ref[0] = y + b_ref[...] + wpe_ref[...]


def _ln_qkv_kernel(x_ref, g_ref, b_ref, w_ref, bias_ref, o_ref):
    # Fused LayerNorm -> (E -> 3E) qkv projection; bf16 output (consumer is the MXU).
    x = x_ref[...]
    mu = jnp.mean(x, axis=-1, keepdims=True)
    var = jnp.mean(jnp.square(x - mu), axis=-1, keepdims=True)
    h = (x - mu) * lax.rsqrt(var + _LN_EPS) * g_ref[...] + b_ref[...]
    y = jnp.dot(h.astype(jnp.bfloat16), w_ref[...],
                preferred_element_type=jnp.float32) + bias_ref[...]
    o_ref[...] = y.astype(o_ref.dtype)


def _attn_proj_kernel(q_ref, k_ref, v_ref, x_ref, pw_ref, pb_ref, o_ref, *,
                      n_head, head_dim):
    # Causal multi-head attention for one batch element + fused output projection + residual.
    # q/k/v blocks are column slices of the fused (B, S, 3E) bf16 qkv tensor.
    # TODO(synk): for long sequences, tile the KV axis flash-style instead of full SxS scores.
    S = q_ref.shape[1]
    H, Dh = n_head, head_dim

    q = q_ref[0]                                           # (S, E) bf16 (scale pre-folded)
    k = k_ref[0]
    v = v_ref[0]
    # One relayout to (H, S, Dh) then a single batched matmul over heads (keeps MXU streaming
    # instead of per-head unaligned slices/matmuls).
    q3 = q.reshape(S, H, Dh).transpose(1, 0, 2)
    k3 = k.reshape(S, H, Dh).transpose(1, 0, 2)
    v3 = v.reshape(S, H, Dh).transpose(1, 0, 2)

    s = lax.dot_general(q3, k3, (((2,), (2,)), ((0,), (0,))),
                        preferred_element_type=jnp.float32)          # (H, S, S)
    row = lax.broadcasted_iota(jnp.int32, (S, S), 0)
    col = lax.broadcasted_iota(jnp.int32, (S, S), 1)
    s = jnp.where(col <= row, s, _NEG_INF)                            # causal mask
    m = jnp.max(s, axis=-1, keepdims=True)
    p = jnp.exp(s - m)
    l = jnp.sum(p, axis=-1, keepdims=True)
    o = lax.dot_general(p.astype(jnp.bfloat16), v3, (((2,), (1,)), ((0,), (0,))),
                        preferred_element_type=jnp.float32)          # (H, S, Dh)
    o = o * pl.reciprocal(l, approx=True)                             # divide on the EUP slot

    attn = o.transpose(1, 0, 2).reshape(S, H * Dh)                    # (S, E) f32
    y = jnp.dot(attn.astype(jnp.bfloat16), pw_ref[...],
                preferred_element_type=jnp.float32)
    o_ref[0] = x_ref[0] + y + pb_ref[...]                             # residual fused


def _mlp_kernel(x_ref, g_ref, b_ref, fcw_ref, fcb_ref, pw_ref, pb_ref, o_ref):
    # Fully fused MLP block: ln2 -> fc -> gelu_new -> proj -> residual.
    # The (tm, 4E) intermediate lives entirely in VMEM/vregs.
    x = x_ref[...]
    mu = jnp.mean(x, axis=-1, keepdims=True)
    var = jnp.mean(jnp.square(x - mu), axis=-1, keepdims=True)
    h = (x - mu) * lax.rsqrt(var + _LN_EPS) * g_ref[...] + b_ref[...]
    u = jnp.dot(h.astype(jnp.bfloat16), fcw_ref[...],
                preferred_element_type=jnp.float32) + fcb_ref[...]
    u = 0.5 * u * (1.0 + jnp.tanh(_GELU_C * (u + 0.044715 * u * u * u)))
    y = jnp.dot(u.astype(jnp.bfloat16), pw_ref[...],
                preferred_element_type=jnp.float32) + pb_ref[...]
    o_ref[...] = x + y                                                 # residual fused


def _final_head_kernel(x_ref, g_ref, b_ref, w_ref, bias_ref, o_ref):
    # Fused final LayerNorm + (E -> 1) projection over all positions (VPU mul + lane reduce).
    # Even-position selection happens in the wrapper (the head output is tiny).
    x = x_ref[0]                                                       # (S, E)
    mu = jnp.mean(x, axis=-1, keepdims=True)
    var = jnp.mean(jnp.square(x - mu), axis=-1, keepdims=True)
    xn = (x - mu) * lax.rsqrt(var + _LN_EPS) * g_ref[...] + b_ref[...]
    o_ref[0] = jnp.sum(xn * w_ref[...], axis=-1, keepdims=True) + bias_ref[...]


# ----------------------------- wrappers -----------------------------

def in_embed(prompt, w, b, wpe):
    B, S, P = prompt.shape
    E = w.shape[1]
    assert wpe.shape[0] >= S, "sequence length exceeds n_positions"
    # Zero-pad the contraction dim to a 128-lane multiple (identity on the result).
    Pp = ((P + 127) // 128) * 128
    if Pp != P:
        prompt = jnp.pad(prompt, ((0, 0), (0, 0), (0, Pp - P)))
        w = jnp.pad(w, ((0, Pp - P), (0, 0)))
    wpe_s = wpe[:S]
    ts = min(S, 256)
    return pl.pallas_call(
        _in_embed_kernel,
        out_shape=jax.ShapeDtypeStruct((B, S, E), jnp.float32),
        grid=(B, pl.cdiv(S, ts)),
        in_specs=[pl.BlockSpec((1, ts, Pp), lambda i, j: (i, j, 0)),
                  pl.BlockSpec((Pp, E), lambda i, j: (0, 0)),
                  pl.BlockSpec((1, E), lambda i, j: (0, 0)),
                  pl.BlockSpec((ts, E), lambda i, j: (j, 0))],
        out_specs=pl.BlockSpec((1, ts, E), lambda i, j: (i, j, 0)),
        compiler_params=_cparams(2),
    )(prompt, w, b.reshape(1, E), wpe_s)


def ln_qkv(x, g, b, w, bias):
    B, S, E = x.shape
    N = w.shape[1]
    x2 = x.reshape(-1, E)
    M = x2.shape[0]
    tm = _row_tile_size(M)
    y = pl.pallas_call(
        _ln_qkv_kernel,
        out_shape=jax.ShapeDtypeStruct((M, N), jnp.bfloat16),
        grid=(pl.cdiv(M, tm),),
        in_specs=[pl.BlockSpec((tm, E), lambda i: (i, 0)),
                  pl.BlockSpec((1, E), lambda i: (0, 0)),
                  pl.BlockSpec((1, E), lambda i: (0, 0)),
                  pl.BlockSpec((E, N), lambda i: (0, 0)),     # weight stays VMEM-resident
                  pl.BlockSpec((1, N), lambda i: (0, 0))],
        out_specs=pl.BlockSpec((tm, N), lambda i: (i, 0)),
        compiler_params=_cparams(1),
    )(x2, g.reshape(1, E), b.reshape(1, E), w, bias.reshape(1, N))
    return y.reshape(B, S, N)


def attention_proj_residual(qkv, x, proj_w, proj_b, n_head):
    """qkv: (B, S, 3E) bf16 fused projection; returns x + out_proj(attention)  (B, S, E) f32."""
    B, S, E = x.shape
    assert E % 128 == 0, "embedding_dim must be a multiple of 128 for the fused attention kernel"
    assert E % n_head == 0
    Dh = E // n_head
    kernel = partial(_attn_proj_kernel, n_head=n_head, head_dim=Dh)
    return pl.pallas_call(
        kernel,
        out_shape=jax.ShapeDtypeStruct((B, S, E), jnp.float32),
        grid=(B,),
        in_specs=[pl.BlockSpec((1, S, E), lambda b: (b, 0, 0)),     # Q columns of qkv
                  pl.BlockSpec((1, S, E), lambda b: (b, 0, 1)),     # K columns
                  pl.BlockSpec((1, S, E), lambda b: (b, 0, 2)),     # V columns
                  pl.BlockSpec((1, S, E), lambda b: (b, 0, 0)),     # residual x
                  pl.BlockSpec((E, E), lambda b: (0, 0)),           # out-proj weight (resident)
                  pl.BlockSpec((1, E), lambda b: (0, 0))],
        out_specs=pl.BlockSpec((1, S, E), lambda b: (b, 0, 0)),
        compiler_params=_cparams(1),
    )(qkv, qkv, qkv, x, proj_w, proj_b.reshape(1, E))


def mlp_block(x, g, b, fc_w, fc_b, proj_w, proj_b):
    B, S, E = x.shape
    N = fc_w.shape[1]
    x2 = x.reshape(-1, E)
    M = x2.shape[0]
    tm = _row_tile_size(M)
    y = pl.pallas_call(
        _mlp_kernel,
        out_shape=jax.ShapeDtypeStruct((M, E), jnp.float32),
        grid=(pl.cdiv(M, tm),),
        in_specs=[pl.BlockSpec((tm, E), lambda i: (i, 0)),
                  pl.BlockSpec((1, E), lambda i: (0, 0)),
                  pl.BlockSpec((1, E), lambda i: (0, 0)),
                  pl.BlockSpec((E, N), lambda i: (0, 0)),
                  pl.BlockSpec((1, N), lambda i: (0, 0)),
                  pl.BlockSpec((N, E), lambda i: (0, 0)),
                  pl.BlockSpec((1, E), lambda i: (0, 0))],
        out_specs=pl.BlockSpec((tm, E), lambda i: (i, 0)),
        compiler_params=_cparams(1),
    )(x2, g.reshape(1, E), b.reshape(1, E), fc_w, fc_b.reshape(1, N),
      proj_w, proj_b.reshape(1, E))
    return y.reshape(B, S, E)


def final_head(x, g, b, w_out, b_out):
    B, S, E = x.shape
    y = pl.pallas_call(
        _final_head_kernel,
        out_shape=jax.ShapeDtypeStruct((B, S, 1), jnp.float32),
        grid=(B,),
        in_specs=[pl.BlockSpec((1, S, E), lambda i: (i, 0, 0)),
                  pl.BlockSpec((1, E), lambda i: (0, 0)),
                  pl.BlockSpec((1, E), lambda i: (0, 0)),
                  pl.BlockSpec((1, E), lambda i: (0, 0)),
                  pl.BlockSpec((1, 1), lambda i: (0, 0))],
        out_specs=pl.BlockSpec((1, S, 1), lambda i: (i, 0, 0)),
        compiler_params=_cparams(1),
    )(x, g.reshape(1, E), b.reshape(1, E), w_out.reshape(1, E), b_out.reshape(1, 1))
    # pred[:, ::2, 0][:, arange(S//2)] == pred[:, ::2, 0]
    return y[:, ::2, 0]                                               # (B, S//2)


# ----------------------------- model: params + forward -----------------------------

def init_params(key, prompt_dim, embd, n_layer, n_head, max_pos):
    std = 0.02
    keys = iter(jax.random.split(key, 4 + 4 * n_layer))
    scale = 1.0 / math.sqrt(embd // n_head)

    def w_f32(shape):
        return std * jax.random.normal(next(keys), shape, jnp.float32)

    def w(shape):
        return w_f32(shape).astype(jnp.bfloat16)

    params = {
        "in_w": w((prompt_dim, embd)),
        "in_b": jnp.zeros((embd,), jnp.float32),
        "wpe": w_f32((max_pos, embd)),
        "lnf_g": jnp.ones((embd,), jnp.float32),
        "lnf_b": jnp.zeros((embd,), jnp.float32),
        "out_w": w_f32((embd, 1)),
        "out_b": jnp.zeros((1,), jnp.float32),
        "layers": [],
    }
    for _ in range(n_layer):
        # Fold the 1/sqrt(Dh) attention scale into the q columns of the qkv projection
        # (mathematically identical to scaling q inside attention; saves a VPU multiply).
        aw = w_f32((embd, 3 * embd))
        aw = aw.at[:, :embd].multiply(scale)
        ab = jnp.zeros((3 * embd,), jnp.float32)
        ab = ab.at[:embd].multiply(scale)
        params["layers"].append({
            "ln1_g": jnp.ones((embd,), jnp.float32), "ln1_b": jnp.zeros((embd,), jnp.float32),
            "attn_w": aw.astype(jnp.bfloat16), "attn_b": ab,
            "proj_w": w((embd, embd)), "proj_b": jnp.zeros((embd,), jnp.float32),
            "ln2_g": jnp.ones((embd,), jnp.float32), "ln2_b": jnp.zeros((embd,), jnp.float32),
            "fc_w": w((embd, 4 * embd)), "fc_b": jnp.zeros((4 * embd,), jnp.float32),
            "mlp_proj_w": w((4 * embd, embd)), "mlp_proj_b": jnp.zeros((embd,), jnp.float32),
        })
    return params


def forward(params, prompt, *, n_head):
    """Mirrors MnistMSEClassifierModel.forward(prompt, inds=None) (all dropout probs are 0)."""
    x = in_embed(prompt, params["in_w"], params["in_b"], params["wpe"])        # (B, S, E) f32
    for layer in params["layers"]:
        qkv = ln_qkv(x, layer["ln1_g"], layer["ln1_b"],
                     layer["attn_w"], layer["attn_b"])                         # (B, S, 3E) bf16
        x = attention_proj_residual(qkv, x, layer["proj_w"], layer["proj_b"], n_head)
        x = mlp_block(x, layer["ln2_g"], layer["ln2_b"],
                      layer["fc_w"], layer["fc_b"],
                      layer["mlp_proj_w"], layer["mlp_proj_b"])
    return final_head(x, params["lnf_g"], params["lnf_b"],
                      params["out_w"], params["out_b"])                        # (B, S//2)


# ----------------------------- demo -----------------------------

if __name__ == "__main__":
    # Small, structure-preserving hyperparameters (module defaults are 784/256/12/4).
    B, S = 2, 8                      # sequence length S must be even (prompt pairs)
    prompt_dim, embedding_dim = 64, 128
    n_layer, n_head = 2, 4
    n_positions = 8                  # GPT2Config(n_positions=2*n_positions) -> max_pos = 16

    key = jax.random.PRNGKey(0)
    pkey, xkey = jax.random.split(key)
    params = init_params(pkey, prompt_dim, embedding_dim, n_layer, n_head,
                         max_pos=2 * n_positions)
    prompt = jax.random.normal(xkey, (B, S, prompt_dim), dtype=jnp.float32)

    fwd = jax.jit(partial(forward, n_head=n_head))
    out = jax.block_until_ready(fwd(params, prompt))
    assert out.shape == (B, S // 2), out.shape
    assert bool(jnp.all(jnp.isfinite(out)))
    print("KERNEL_OK")
</pallas_src>

<mosaic_0001>
module attributes {stable_mosaic.version = 11 : i64} {
  func.func @_in_embed_kernel(%arg0: i32, %arg1: i32, %arg2: memref<1x8x128xf32, #tpu.memory_space<vmem>>, %arg3: memref<128x128xbf16, #tpu.memory_space<vmem>>, %arg4: memref<1x128xf32, #tpu.memory_space<vmem>>, %arg5: memref<8x128xf32, #tpu.memory_space<vmem>>, %arg6: memref<1x8x128xf32, #tpu.memory_space<vmem>>) attributes {dimension_semantics = [#tpu.dimension_semantics<parallel>, #tpu.dimension_semantics<parallel>], iteration_bounds = array<i64: 2, 1>, scalar_prefetch = 0 : i64, scratch_operands = 0 : i64, tpu.core_type = #tpu.core_type<tc>, window_params = [{transform_indices = @transform_0, window_bounds = array<i64: 1, 8, 128>}, {pipeline_mode = #tpu.pipeline_mode<synchronous>, transform_indices = @transform_1, window_bounds = array<i64: 128, 128>}, {pipeline_mode = #tpu.pipeline_mode<synchronous>, transform_indices = @transform_2, window_bounds = array<i64: 1, 128>}, {transform_indices = @transform_3, window_bounds = array<i64: 8, 128>}, {transform_indices = @transform_4, window_bounds = array<i64: 1, 8, 128>}]} {
    %c0 = arith.constant 0 : index
    %c0_0 = arith.constant 0 : index
    %c0_1 = arith.constant 0 : index
    %0 = vector.load %arg2[%c0, %c0_0, %c0_1] : memref<1x8x128xf32, #tpu.memory_space<vmem>>, vector<1x8x128xf32>
    %1 = vector.shape_cast %0 : vector<1x8x128xf32> to vector<8x128xf32>
    %2 = arith.truncf %1 : vector<8x128xf32> to vector<8x128xbf16>
    %c0_2 = arith.constant 0 : index
    %c0_3 = arith.constant 0 : index
    %3 = vector.load %arg3[%c0_2, %c0_3] : memref<128x128xbf16, #tpu.memory_space<vmem>>, vector<128x128xbf16>
    %cst = arith.constant dense<0.000000e+00> : vector<8x128xf32>
    %4 = tpu.matmul %2, %3, %cst {dimension_numbers = #tpu.dot_dimension_numbers<[1], [0], [0], [1], [0, 0, 1, 1], [], []>} : vector<8x128xbf16>, vector<128x128xbf16>, vector<8x128xf32> -> vector<8x128xf32>
    %c0_4 = arith.constant 0 : index
    %c0_5 = arith.constant 0 : index
    %5 = vector.load %arg4[%c0_4, %c0_5] : memref<1x128xf32, #tpu.memory_space<vmem>>, vector<1x128xf32>
    %6 = vector.broadcast %5 : vector<1x128xf32> to vector<8x128xf32>
    %7 = arith.addf %4, %6 : vector<8x128xf32>
    %c0_6 = arith.constant 0 : index
    %c0_7 = arith.constant 0 : index
    %8 = vector.load %arg5[%c0_6, %c0_7] : memref<8x128xf32, #tpu.memory_space<vmem>>, vector<8x128xf32>
    %9 = arith.addf %7, %8 : vector<8x128xf32>
    %c0_8 = arith.constant 0 : index
    %c0_9 = arith.constant 0 : index
    %c0_10 = arith.constant 0 : index
    %10 = vector.load %arg6[%c0_8, %c0_9, %c0_10] : memref<1x8x128xf32, #tpu.memory_space<vmem>>, vector<1x8x128xf32>
    %11 = vector.shape_cast %10 : vector<1x8x128xf32> to vector<8x128xf32>
    %12 = vector.shape_cast %9 : vector<8x128xf32> to vector<1x8x128xf32>
    tpu.vector_store %arg6[%c0_8, %c0_9, %c0_10], %12 {strides = array<i32>} : memref<1x8x128xf32, #tpu.memory_space<vmem>>, vector<1x8x128xf32>,
    return
  }
  func.func @transform_0(%arg0: i32, %arg1: i32) -> (i32, i32, i32) {
    %c0_i32 = arith.constant 0 : i32
    %c0_i32_0 = arith.constant 0 : i32
    return %arg0, %arg1, %c0_i32 : i32, i32, i32
  }
  func.func @transform_1(%arg0: i32, %arg1: i32) -> (i32, i32) {
    %c0_i32 = arith.constant 0 : i32
    %c0_i32_0 = arith.constant 0 : i32
    %c0_i32_1 = arith.constant 0 : i32
    return %c0_i32, %c0_i32_0 : i32, i32
  }
  func.func @transform_2(%arg0: i32, %arg1: i32) -> (i32, i32) {
    %c0_i32 = arith.constant 0 : i32
    %c0_i32_0 = arith.constant 0 : i32
    %c0_i32_1 = arith.constant 0 : i32
    return %c0_i32, %c0_i32_0 : i32, i32
  }
  func.func @transform_3(%arg0: i32, %arg1: i32) -> (i32, i32) {
    %c0_i32 = arith.constant 0 : i32
    %c0_i32_0 = arith.constant 0 : i32
    return %arg1, %c0_i32 : i32, i32
  }
  func.func @transform_4(%arg0: i32, %arg1: i32) -> (i32, i32, i32) {
    %c0_i32 = arith.constant 0 : i32
    %c0_i32_0 = arith.constant 0 : i32
    return %arg0, %arg1, %c0_i32 : i32, i32, i32
  }
}

module attributes {stable_mosaic.version = 11 : i64} {
  func.func @_ln_qkv_kernel(%arg0: i32, %arg1: memref<16x128xf32, #tpu.memory_space<vmem>>, %arg2: memref<1x128xf32, #tpu.memory_space<vmem>>, %arg3: memref<1x128xf32, #tpu.memory_space<vmem>>, %arg4: memref<128x384xbf16, #tpu.memory_space<vmem>>, %arg5: memref<1x384xf32, #tpu.memory_space<vmem>>, %arg6: memref<16x384xbf16, #tpu.memory_space<vmem>>) attributes {dimension_semantics = [#tpu.dimension_semantics<parallel>], iteration_bounds = array<i64: 1>, scalar_prefetch = 0 : i64, scratch_operands = 0 : i64, tpu.core_type = #tpu.core_type<tc>, window_params = [{transform_indices = @transform_0, window_bounds = array<i64: 16, 128>}, {pipeline_mode = #tpu.pipeline_mode<synchronous>, transform_indices = @transform_1, window_bounds = array<i64: 1, 128>}, {pipeline_mode = #tpu.pipeline_mode<synchronous>, transform_indices = @transform_2, window_bounds = array<i64: 1, 128>}, {pipeline_mode = #tpu.pipeline_mode<synchronous>, transform_indices = @transform_3, window_bounds = array<i64: 128, 384>}, {pipeline_mode = #tpu.pipeline_mode<synchronous>, transform_indices = @transform_4, window_bounds = array<i64: 1, 384>}, {transform_indices = @transform_5, window_bounds = array<i64: 16, 384>}]} {
    %c0 = arith.constant 0 : index
    %c0_0 = arith.constant 0 : index
    %0 = vector.load %arg1[%c0, %c0_0] : memref<16x128xf32, #tpu.memory_space<vmem>>, vector<16x128xf32>
    %cst = arith.constant dense<0.000000e+00> : vector<16xf32>
    %1 = vector.multi_reduction <add>, %0, %cst [1] : vector<16x128xf32> to vector<16xf32>
    %2 = vector.shape_cast %1 : vector<16xf32> to vector<16x1xf32>
    %cst_1 = arith.constant 1.280000e+02 : f32
    %3 = vector.broadcast %cst_1 : f32 to vector<16x1xf32>
    %4 = arith.divf %2, %3 : vector<16x1xf32>
    %5 = vector.broadcast %4 : vector<16x1xf32> to vector<16x128xf32>
    %6 = arith.subf %0, %5 : vector<16x128xf32>
    %7 = arith.mulf %6, %6 : vector<16x128xf32>
    %cst_2 = arith.constant dense<0.000000e+00> : vector<16xf32>
    %8 = vector.multi_reduction <add>, %7, %cst_2 [1] : vector<16x128xf32> to vector<16xf32>
    %9 = vector.shape_cast %8 : vector<16xf32> to vector<16x1xf32>
    %cst_3 = arith.constant 1.280000e+02 : f32
    %10 = vector.broadcast %cst_3 : f32 to vector<16x1xf32>
    %11 = arith.divf %9, %10 : vector<16x1xf32>
    %12 = vector.broadcast %4 : vector<16x1xf32> to vector<16x128xf32>
    %13 = arith.subf %0, %12 : vector<16x128xf32>
    %cst_4 = arith.constant 9.99999974E-6 : f32
    %14 = vector.broadcast %cst_4 : f32 to vector<16x1xf32>
    %15 = arith.addf %11, %14 : vector<16x1xf32>
    %16 = math.rsqrt %15 : vector<16x1xf32>
    %17 = vector.broadcast %16 : vector<16x1xf32> to vector<16x128xf32>
    %18 = arith.mulf %13, %17 : vector<16x128xf32>
    %c0_5 = arith.constant 0 : index
    %c0_6 = arith.constant 0 : index
    %19 = vector.load %arg2[%c0_5, %c0_6] : memref<1x128xf32, #tpu.memory_space<vmem>>, vector<1x128xf32>
    %20 = vector.broadcast %19 : vector<1x128xf32> to vector<16x128xf32>
    %21 = arith.mulf %18, %20 : vector<16x128xf32>
    %c0_7 = arith.constant 0 : index
    %c0_8 = arith.constant 0 : index
    %22 = vector.load %arg3[%c0_7, %c0_8] : memref<1x128xf32, #tpu.memory_space<vmem>>, vector<1x128xf32>
    %23 = vector.broadcast %22 : vector<1x128xf32> to vector<16x128xf32>
    %24 = arith.addf %21, %23 : vector<16x128xf32>
    %25 = arith.truncf %24 : vector<16x128xf32> to vector<16x128xbf16>
    %c0_9 = arith.constant 0 : index
    %c0_10 = arith.constant 0 : index
    %26 = vector.load %arg4[%c0_9, %c0_10] : memref<128x384xbf16, #tpu.memory_space<vmem>>, vector<128x384xbf16>
    %cst_11 = arith.constant dense<0.000000e+00> : vector<16x384xf32>
    %27 = tpu.matmul %25, %26, %cst_11 {dimension_numbers = #tpu.dot_dimension_numbers<[1], [0], [0], [1], [0, 0, 1, 1], [], []>} : vector<16x128xbf16>, vector<128x384xbf16>, vector<16x384xf32> -> vector<16x384xf32>
    %c0_12 = arith.constant 0 : index
    %c0_13 = arith.constant 0 : index
    %28 = vector.load %arg5[%c0_12, %c0_13] : memref<1x384xf32, #tpu.memory_space<vmem>>, vector<1x384xf32>
    %29 = vector.broadcast %28 : vector<1x384xf32> to vector<16x384xf32>
    %30 = arith.addf %27, %29 : vector<16x384xf32>
    %31 = arith.truncf %30 : vector<16x384xf32> to vector<16x384xbf16>
    %c0_14 = arith.constant 0 : index
    %c0_15 = arith.constant 0 : index
    %32 = vector.load %arg6[%c0_14, %c0_15] : memref<16x384xbf16, #tpu.memory_space<vmem>>, vector<16x384xbf16>
    tpu.vector_store %arg6[%c0_14, %c0_15], %31 {strides = array<i32>} : memref<16x384xbf16, #tpu.memory_space<vmem>>, vector<16x384xbf16>,
    return
  }
  func.func @transform_0(%arg0: i32) -> (i32, i32) {
    %c0_i32 = arith.constant 0 : i32
    %c0_i32_0 = arith.constant 0 : i32
    return %arg0, %c0_i32 : i32, i32
  }
  func.func @transform_1(%arg0: i32) -> (i32, i32) {
    %c0_i32 = arith.constant 0 : i32
    %c0_i32_0 = arith.constant 0 : i32
    %c0_i32_1 = arith.constant 0 : i32
    return %c0_i32, %c0_i32_0 : i32, i32
  }
  func.func @transform_2(%arg0: i32) -> (i32, i32) {
    %c0_i32 = arith.constant 0 : i32
    %c0_i32_0 = arith.constant 0 : i32
    %c0_i32_1 = arith.constant 0 : i32
    return %c0_i32, %c0_i32_0 : i32, i32
  }
  func.func @transform_3(%arg0: i32) -> (i32, i32) {
    %c0_i32 = arith.constant 0 : i32
    %c0_i32_0 = arith.constant 0 : i32
    %c0_i32_1 = arith.constant 0 : i32
    return %c0_i32, %c0_i32_0 : i32, i32
  }
  func.func @transform_4(%arg0: i32) -> (i32, i32) {
    %c0_i32 = arith.constant 0 : i32
    %c0_i32_0 = arith.constant 0 : i32
    %c0_i32_1 = arith.constant 0 : i32
    return %c0_i32, %c0_i32_0 : i32, i32
  }
  func.func @transform_5(%arg0: i32) -> (i32, i32) {
    %c0_i32 = arith.constant 0 : i32
    %c0_i32_0 = arith.constant 0 : i32
    return %arg0, %c0_i32 : i32, i32
  }
}

module attributes {stable_mosaic.version = 11 : i64} {
  func.func @_attn_proj_kernel(%arg0: i32, %arg1: memref<1x8x128xbf16, #tpu.memory_space<vmem>>, %arg2: memref<1x8x128xbf16, #tpu.memory_space<vmem>>, %arg3: memref<1x8x128xbf16, #tpu.memory_space<vmem>>, %arg4: memref<1x8x128xf32, #tpu.memory_space<vmem>>, %arg5: memref<128x128xbf16, #tpu.memory_space<vmem>>, %arg6: memref<1x128xf32, #tpu.memory_space<vmem>>, %arg7: memref<1x8x128xf32, #tpu.memory_space<vmem>>) attributes {dimension_semantics = [#tpu.dimension_semantics<parallel>], iteration_bounds = array<i64: 2>, scalar_prefetch = 0 : i64, scratch_operands = 0 : i64, tpu.core_type = #tpu.core_type<tc>, window_params = [{transform_indices = @transform_0, window_bounds = array<i64: 1, 8, 128>}, {transform_indices = @transform_1, window_bounds = array<i64: 1, 8, 128>}, {transform_indices = @transform_2, window_bounds = array<i64: 1, 8, 128>}, {transform_indices = @transform_3, window_bounds = array<i64: 1, 8, 128>}, {pipeline_mode = #tpu.pipeline_mode<synchronous>, transform_indices = @transform_4, window_bounds = array<i64: 128, 128>}, {pipeline_mode = #tpu.pipeline_mode<synchronous>, transform_indices = @transform_5, window_bounds = array<i64: 1, 128>}, {transform_indices = @transform_6, window_bounds = array<i64: 1, 8, 128>}]} {
    %c0 = arith.constant 0 : index
    %c0_0 = arith.constant 0 : index
    %c0_1 = arith.constant 0 : index
    %0 = vector.load %arg1[%c0, %c0_0, %c0_1] : memref<1x8x128xbf16, #tpu.memory_space<vmem>>, vector<1x8x128xbf16>
    %1 = vector.shape_cast %0 : vector<1x8x128xbf16> to vector<8x128xbf16>
    %c0_2 = arith.constant 0 : index
    %c0_3 = arith.constant 0 : index
    %c0_4 = arith.constant 0 : index
    %2 = vector.load %arg2[%c0_2, %c0_3, %c0_4] : memref<1x8x128xbf16, #tpu.memory_space<vmem>>, vector<1x8x128xbf16>
    %3 = vector.shape_cast %2 : vector<1x8x128xbf16> to vector<8x128xbf16>
    %c0_5 = arith.constant 0 : index
    %c0_6 = arith.constant 0 : index
    %c0_7 = arith.constant 0 : index
    %4 = vector.load %arg3[%c0_5, %c0_6, %c0_7] : memref<1x8x128xbf16, #tpu.memory_space<vmem>>, vector<1x8x128xbf16>
    %5 = vector.shape_cast %4 : vector<1x8x128xbf16> to vector<8x128xbf16>
    %6 = vector.shape_cast %1 : vector<8x128xbf16> to vector<8x4x32xbf16>
    %7 = tpu.transpose %6, [1, 0, 2] : vector<8x4x32xbf16> -> vector<4x8x32xbf16>
    %8 = vector.shape_cast %3 : vector<8x128xbf16> to vector<8x4x32xbf16>
    %9 = tpu.transpose %8, [1, 0, 2] : vector<8x4x32xbf16> -> vector<4x8x32xbf16>
    %10 = vector.shape_cast %5 : vector<8x128xbf16> to vector<8x4x32xbf16>
    %11 = tpu.transpose %10, [1, 0, 2] : vector<8x4x32xbf16> -> vector<4x8x32xbf16>
    %cst = arith.constant dense<0.000000e+00> : vector<4x8x8xf32>
    %12 = tpu.matmul %7, %9, %cst {dimension_numbers = #tpu.dot_dimension_numbers<[2], [2], [1], [1], [0, 0, 0, 1, 1, 1], [0], [0]>} : vector<4x8x32xbf16>, vector<4x8x32xbf16>, vector<4x8x8xf32> -> vector<4x8x8xf32>
    %13 = tpu.iota {dimensions = array<i32: 0>} : vector<8x8xi32>
    %14 = tpu.iota {dimensions = array<i32: 1>} : vector<8x8xi32>
    %15 = arith.cmpi sle, %14, %13 : vector<8x8xi32>
    %cst_8 = arith.constant -1.000000e+30 : f32
    %16 = vector.shape_cast %15 : vector<8x8xi1> to vector<1x8x8xi1>
    %17 = vector.broadcast %16 : vector<1x8x8xi1> to vector<4x8x8xi1>
    %18 = vector.broadcast %cst_8 : f32 to vector<4x8x8xf32>
    %19 = arith.select %17, %12, %18 : vector<4x8x8xi1>, vector<4x8x8xf32>
    %cst_9 = arith.constant dense<0xFF800000> : vector<4x8xf32>
    %20 = vector.multi_reduction <maximumf>, %19, %cst_9 [2] : vector<4x8x8xf32> to vector<4x8xf32>
    %21 = vector.shape_cast %20 : vector<4x8xf32> to vector<4x8x1xf32>
    %22 = vector.broadcast %21 : vector<4x8x1xf32> to vector<4x8x8xf32>
    %23 = arith.subf %19, %22 : vector<4x8x8xf32>
    %24 = math.exp %23 : vector<4x8x8xf32>
    %cst_10 = arith.constant dense<0.000000e+00> : vector<4x8xf32>
    %25 = vector.multi_reduction <add>, %24, %cst_10 [2] : vector<4x8x8xf32> to vector<4x8xf32>
    %26 = vector.shape_cast %25 : vector<4x8xf32> to vector<4x8x1xf32>
    %27 = arith.truncf %24 : vector<4x8x8xf32> to vector<4x8x8xbf16>
    %cst_11 = arith.constant dense<0.000000e+00> : vector<4x8x32xf32>
    %28 = tpu.matmul %27, %11, %cst_11 {dimension_numbers = #tpu.dot_dimension_numbers<[2], [1], [1], [2], [0, 0, 0, 1, 1, 2], [0], [0]>} : vector<4x8x8xbf16>, vector<4x8x32xbf16>, vector<4x8x32xf32> -> vector<4x8x32xf32>
    %29 = tpu.reciprocal %26 {approx = true} : vector<4x8x1xf32> -> vector<4x8x1xf32>
    %30 = vector.broadcast %29 : vector<4x8x1xf32> to vector<4x8x32xf32>
    %31 = arith.mulf %28, %30 : vector<4x8x32xf32>
    %32 = tpu.transpose %31, [1, 0, 2] : vector<4x8x32xf32> -> vector<8x4x32xf32>
    %33 = vector.shape_cast %32 : vector<8x4x32xf32> to vector<8x128xf32>
    %34 = arith.truncf %33 : vector<8x128xf32> to vector<8x128xbf16>
    %c0_12 = arith.constant 0 : index
    %c0_13 = arith.constant 0 : index
    %35 = vector.load %arg5[%c0_12, %c0_13] : memref<128x128xbf16, #tpu.memory_space<vmem>>, vector<128x128xbf16>
    %cst_14 = arith.constant dense<0.000000e+00> : vector<8x128xf32>
    %36 = tpu.matmul %34, %35, %cst_14 {dimension_numbers = #tpu.dot_dimension_numbers<[1], [0], [0], [1], [0, 0, 1, 1], [], []>} : vector<8x128xbf16>, vector<128x128xbf16>, vector<8x128xf32> -> vector<8x128xf32>
    %c0_15 = arith.constant 0 : index
    %c0_16 = arith.constant 0 : index
    %c0_17 = arith.constant 0 : index
    %37 = vector.load %arg4[%c0_15, %c0_16, %c0_17] : memref<1x8x128xf32, #tpu.memory_space<vmem>>, vector<1x8x128xf32>
    %38 = vector.shape_cast %37 : vector<1x8x128xf32> to vector<8x128xf32>
    %39 = arith.addf %38, %36 : vector<8x128xf32>
    %c0_18 = arith.constant 0 : index
    %c0_19 = arith.constant 0 : index
    %40 = vector.load %arg6[%c0_18, %c0_19] : memref<1x128xf32, #tpu.memory_space<vmem>>, vector<1x128xf32>
    %41 = vector.broadcast %40 : vector<1x128xf32> to vector<8x128xf32>
    %42 = arith.addf %39, %41 : vector<8x128xf32>
    %c0_20 = arith.constant 0 : index
    %c0_21 = arith.constant 0 : index
    %c0_22 = arith.constant 0 : index
    %43 = vector.load %arg7[%c0_20, %c0_21, %c0_22] : memref<1x8x128xf32, #tpu.memory_space<vmem>>, vector<1x8x128xf32>
    %44 = vector.shape_cast %43 : vector<1x8x128xf32> to vector<8x128xf32>
    %45 = vector.shape_cast %42 : vector<8x128xf32> to vector<1x8x128xf32>
    tpu.vector_store %arg7[%c0_20, %c0_21, %c0_22], %45 {strides = array<i32>} : memref<1x8x128xf32, #tpu.memory_space<vmem>>, vector<1x8x128xf32>,
    return
  }
  func.func @transform_0(%arg0: i32) -> (i32, i32, i32) {
    %c0_i32 = arith.constant 0 : i32
    %c0_i32_0 = arith.constant 0 : i32
    %c0_i32_1 = arith.constant 0 : i32
    return %arg0, %c0_i32, %c0_i32_0 : i32, i32, i32
  }
  func.func @transform_1(%arg0: i32) -> (i32, i32, i32) {
    %c0_i32 = arith.constant 0 : i32
    %c1_i32 = arith.constant 1 : i32
    %c0_i32_0 = arith.constant 0 : i32
    return %arg0, %c0_i32, %c1_i32 : i32, i32, i32
  }
  func.func @transform_2(%arg0: i32) -> (i32, i32, i32) {
    %c0_i32 = arith.constant 0 : i32
    %c2_i32 = arith.constant 2 : i32
    %c0_i32_0 = arith.constant 0 : i32
    return %arg0, %c0_i32, %c2_i32 : i32, i32, i32
  }
  func.func @transform_3(%arg0: i32) -> (i32, i32, i32) {
    %c0_i32 = arith.constant 0 : i32
    %c0_i32_0 = arith.constant 0 : i32
    %c0_i32_1 = arith.constant 0 : i32
    return %arg0, %c0_i32, %c0_i32_0 : i32, i32, i32
  }
  func.func @transform_4(%arg0: i32) -> (i32, i32) {
    %c0_i32 = arith.constant 0 : i32
    %c0_i32_0 = arith.constant 0 : i32
    %c0_i32_1 = arith.constant 0 : i32
    return %c0_i32, %c0_i32_0 : i32, i32
  }
  func.func @transform_5(%arg0: i32) -> (i32, i32) {
    %c0_i32 = arith.constant 0 : i32
    %c0_i32_0 = arith.constant 0 : i32
    %c0_i32_1 = arith.constant 0 : i32
    return %c0_i32, %c0_i32_0 : i32, i32
  }
  func.func @transform_6(%arg0: i32) -> (i32, i32, i32) {
    %c0_i32 = arith.constant 0 : i32
    %c0_i32_0 = arith.constant 0 : i32
    %c0_i32_1 = arith.constant 0 : i32
    return %arg0, %c0_i32, %c0_i32_0 : i32, i32, i32
  }
}

module attributes {stable_mosaic.version = 11 : i64} {
  func.func @_mlp_kernel(%arg0: i32, %arg1: memref<16x128xf32, #tpu.memory_space<vmem>>, %arg2: memref<1x128xf32, #tpu.memory_space<vmem>>, %arg3: memref<1x128xf32, #tpu.memory_space<vmem>>, %arg4: memref<128x512xbf16, #tpu.memory_space<vmem>>, %arg5: memref<1x512xf32, #tpu.memory_space<vmem>>, %arg6: memref<512x128xbf16, #tpu.memory_space<vmem>>, %arg7: memref<1x128xf32, #tpu.memory_space<vmem>>, %arg8: memref<16x128xf32, #tpu.memory_space<vmem>>) attributes {dimension_semantics = [#tpu.dimension_semantics<parallel>], iteration_bounds = array<i64: 1>, scalar_prefetch = 0 : i64, scratch_operands = 0 : i64, tpu.core_type = #tpu.core_type<tc>, window_params = [{transform_indices = @transform_0, window_bounds = array<i64: 16, 128>}, {pipeline_mode = #tpu.pipeline_mode<synchronous>, transform_indices = @transform_1, window_bounds = array<i64: 1, 128>}, {pipeline_mode = #tpu.pipeline_mode<synchronous>, transform_indices = @transform_2, window_bounds = array<i64: 1, 128>}, {pipeline_mode = #tpu.pipeline_mode<synchronous>, transform_indices = @transform_3, window_bounds = array<i64: 128, 512>}, {pipeline_mode = #tpu.pipeline_mode<synchronous>, transform_indices = @transform_4, window_bounds = array<i64: 1, 512>}, {pipeline_mode = #tpu.pipeline_mode<synchronous>, transform_indices = @transform_5, window_bounds = array<i64: 512, 128>}, {pipeline_mode = #tpu.pipeline_mode<synchronous>, transform_indices = @transform_6, window_bounds = array<i64: 1, 128>}, {transform_indices = @transform_7, window_bounds = array<i64: 16, 128>}]} {
    %c0 = arith.constant 0 : index
    %c0_0 = arith.constant 0 : index
    %0 = vector.load %arg1[%c0, %c0_0] : memref<16x128xf32, #tpu.memory_space<vmem>>, vector<16x128xf32>
    %cst = arith.constant dense<0.000000e+00> : vector<16xf32>
    %1 = vector.multi_reduction <add>, %0, %cst [1] : vector<16x128xf32> to vector<16xf32>
    %2 = vector.shape_cast %1 : vector<16xf32> to vector<16x1xf32>
    %cst_1 = arith.constant 1.280000e+02 : f32
    %3 = vector.broadcast %cst_1 : f32 to vector<16x1xf32>
    %4 = arith.divf %2, %3 : vector<16x1xf32>
    %5 = vector.broadcast %4 : vector<16x1xf32> to vector<16x128xf32>
    %6 = arith.subf %0, %5 : vector<16x128xf32>
    %7 = arith.mulf %6, %6 : vector<16x128xf32>
    %cst_2 = arith.constant dense<0.000000e+00> : vector<16xf32>
    %8 = vector.multi_reduction <add>, %7, %cst_2 [1] : vector<16x128xf32> to vector<16xf32>
    %9 = vector.shape_cast %8 : vector<16xf32> to vector<16x1xf32>
    %cst_3 = arith.constant 1.280000e+02 : f32
    %10 = vector.broadcast %cst_3 : f32 to vector<16x1xf32>
    %11 = arith.divf %9, %10 : vector<16x1xf32>
    %12 = vector.broadcast %4 : vector<16x1xf32> to vector<16x128xf32>
    %13 = arith.subf %0, %12 : vector<16x128xf32>
    %cst_4 = arith.constant 9.99999974E-6 : f32
    %14 = vector.broadcast %cst_4 : f32 to vector<16x1xf32>
    %15 = arith.addf %11, %14 : vector<16x1xf32>
    %16 = math.rsqrt %15 : vector<16x1xf32>
    %17 = vector.broadcast %16 : vector<16x1xf32> to vector<16x128xf32>
    %18 = arith.mulf %13, %17 : vector<16x128xf32>
    %c0_5 = arith.constant 0 : index
    %c0_6 = arith.constant 0 : index
    %19 = vector.load %arg2[%c0_5, %c0_6] : memref<1x128xf32, #tpu.memory_space<vmem>>, vector<1x128xf32>
    %20 = vector.broadcast %19 : vector<1x128xf32> to vector<16x128xf32>
    %21 = arith.mulf %18, %20 : vector<16x128xf32>
    %c0_7 = arith.constant 0 : index
    %c0_8 = arith.constant 0 : index
    %22 = vector.load %arg3[%c0_7, %c0_8] : memref<1x128xf32, #tpu.memory_space<vmem>>, vector<1x128xf32>
    %23 = vector.broadcast %22 : vector<1x128xf32> to vector<16x128xf32>
    %24 = arith.addf %21, %23 : vector<16x128xf32>
    %25 = arith.truncf %24 : vector<16x128xf32> to vector<16x128xbf16>
    %c0_9 = arith.constant 0 : index
    %c0_10 = arith.constant 0 : index
    %26 = vector.load %arg4[%c0_9, %c0_10] : memref<128x512xbf16, #tpu.memory_space<vmem>>, vector<128x512xbf16>
    %cst_11 = arith.constant dense<0.000000e+00> : vector<16x512xf32>
    %27 = tpu.matmul %25, %26, %cst_11 {dimension_numbers = #tpu.dot_dimension_numbers<[1], [0], [0], [1], [0, 0, 1, 1], [], []>} : vector<16x128xbf16>, vector<128x512xbf16>, vector<16x512xf32> -> vector<16x512xf32>
    %c0_12 = arith.constant 0 : index
    %c0_13 = arith.constant 0 : index
    %28 = vector.load %arg5[%c0_12, %c0_13] : memref<1x512xf32, #tpu.memory_space<vmem>>, vector<1x512xf32>
    %29 = vector.broadcast %28 : vector<1x512xf32> to vector<16x512xf32>
    %30 = arith.addf %27, %29 : vector<16x512xf32>
    %cst_14 = arith.constant 5.000000e-01 : f32
    %31 = vector.broadcast %cst_14 : f32 to vector<16x512xf32>
    %32 = arith.mulf %31, %30 : vector<16x512xf32>
    %cst_15 = arith.constant 4.471500e-02 : f32
    %33 = vector.broadcast %cst_15 : f32 to vector<16x512xf32>
    %34 = arith.mulf %33, %30 : vector<16x512xf32>
    %35 = arith.mulf %34, %30 : vector<16x512xf32>
    %36 = arith.mulf %35, %30 : vector<16x512xf32>
    %37 = arith.addf %30, %36 : vector<16x512xf32>
    %cst_16 = arith.constant 0.797884583 : f32
    %38 = vector.broadcast %cst_16 : f32 to vector<16x512xf32>
    %39 = arith.mulf %38, %37 : vector<16x512xf32>
    %40 = math.tanh %39 : vector<16x512xf32>
    %cst_17 = arith.constant 1.000000e+00 : f32
    %41 = vector.broadcast %cst_17 : f32 to vector<16x512xf32>
    %42 = arith.addf %41, %40 : vector<16x512xf32>
    %43 = arith.mulf %32, %42 : vector<16x512xf32>
    %44 = arith.truncf %43 : vector<16x512xf32> to vector<16x512xbf16>
    %c0_18 = arith.constant 0 : index
    %c0_19 = arith.constant 0 : index
    %45 = vector.load %arg6[%c0_18, %c0_19] : memref<512x128xbf16, #tpu.memory_space<vmem>>, vector<512x128xbf16>
    %cst_20 = arith.constant dense<0.000000e+00> : vector<16x128xf32>
    %46 = tpu.matmul %44, %45, %cst_20 {dimension_numbers = #tpu.dot_dimension_numbers<[1], [0], [0], [1], [0, 0, 1, 1], [], []>} : vector<16x512xbf16>, vector<512x128xbf16>, vector<16x128xf32> -> vector<16x128xf32>
    %c0_21 = arith.constant 0 : index
    %c0_22 = arith.constant 0 : index
    %47 = vector.load %arg7[%c0_21, %c0_22] : memref<1x128xf32, #tpu.memory_space<vmem>>, vector<1x128xf32>
    %48 = vector.broadcast %47 : vector<1x128xf32> to vector<16x128xf32>
    %49 = arith.addf %46, %48 : vector<16x128xf32>
    %50 = arith.addf %0, %49 : vector<16x128xf32>
    %c0_23 = arith.constant 0 : index
    %c0_24 = arith.constant 0 : index
    %51 = vector.load %arg8[%c0_23, %c0_24] : memref<16x128xf32, #tpu.memory_space<vmem>>, vector<16x128xf32>
    tpu.vector_store %arg8[%c0_23, %c0_24], %50 {strides = array<i32>} : memref<16x128xf32, #tpu.memory_space<vmem>>, vector<16x128xf32>,
    return
  }
  func.func @transform_0(%arg0: i32) -> (i32, i32) {
    %c0_i32 = arith.constant 0 : i32
    %c0_i32_0 = arith.constant 0 : i32
    return %arg0, %c0_i32 : i32, i32
  }
  func.func @transform_1(%arg0: i32) -> (i32, i32) {
    %c0_i32 = arith.constant 0 : i32
    %c0_i32_0 = arith.constant 0 : i32
    %c0_i32_1 = arith.constant 0 : i32
    return %c0_i32, %c0_i32_0 : i32, i32
  }
  func.func @transform_2(%arg0: i32) -> (i32, i32) {
    %c0_i32 = arith.constant 0 : i32
    %c0_i32_0 = arith.constant 0 : i32
    %c0_i32_1 = arith.constant 0 : i32
    return %c0_i32, %c0_i32_0 : i32, i32
  }
  func.func @transform_3(%arg0: i32) -> (i32, i32) {
    %c0_i32 = arith.constant 0 : i32
    %c0_i32_0 = arith.constant 0 : i32
    %c0_i32_1 = arith.constant 0 : i32
    return %c0_i32, %c0_i32_0 : i32, i32
  }
  func.func @transform_4(%arg0: i32) -> (i32, i32) {
    %c0_i32 = arith.constant 0 : i32
    %c0_i32_0 = arith.constant 0 : i32
    %c0_i32_1 = arith.constant 0 : i32
    return %c0_i32, %c0_i32_0 : i32, i32
  }
  func.func @transform_5(%arg0: i32) -> (i32, i32) {
    %c0_i32 = arith.constant 0 : i32
    %c0_i32_0 = arith.constant 0 : i32
    %c0_i32_1 = arith.constant 0 : i32
    return %c0_i32, %c0_i32_0 : i32, i32
  }
  func.func @transform_6(%arg0: i32) -> (i32, i32) {
    %c0_i32 = arith.constant 0 : i32
    %c0_i32_0 = arith.constant 0 : i32
    %c0_i32_1 = arith.constant 0 : i32
    return %c0_i32, %c0_i32_0 : i32, i32
  }
  func.func @transform_7(%arg0: i32) -> (i32, i32) {
    %c0_i32 = arith.constant 0 : i32
    %c0_i32_0 = arith.constant 0 : i32
    return %arg0, %c0_i32 : i32, i32
  }
}

module attributes {stable_mosaic.version = 11 : i64} {
  func.func @_final_head_kernel(%arg0: i32, %arg1: memref<1x8x128xf32, #tpu.memory_space<vmem>>, %arg2: memref<1x128xf32, #tpu.memory_space<vmem>>, %arg3: memref<1x128xf32, #tpu.memory_space<vmem>>, %arg4: memref<1x128xf32, #tpu.memory_space<vmem>>, %arg5: memref<1x1xf32, #tpu.memory_space<vmem>>, %arg6: memref<1x8x1xf32, #tpu.memory_space<vmem>>) attributes {dimension_semantics = [#tpu.dimension_semantics<parallel>], iteration_bounds = array<i64: 2>, scalar_prefetch = 0 : i64, scratch_operands = 0 : i64, tpu.core_type = #tpu.core_type<tc>, window_params = [{transform_indices = @transform_0, window_bounds = array<i64: 1, 8, 128>}, {pipeline_mode = #tpu.pipeline_mode<synchronous>, transform_indices = @transform_1, window_bounds = array<i64: 1, 128>}, {pipeline_mode = #tpu.pipeline_mode<synchronous>, transform_indices = @transform_2, window_bounds = array<i64: 1, 128>}, {pipeline_mode = #tpu.pipeline_mode<synchronous>, transform_indices = @transform_3, window_bounds = array<i64: 1, 128>}, {pipeline_mode = #tpu.pipeline_mode<synchronous>, transform_indices = @transform_4, window_bounds = array<i64: 1, 1>}, {transform_indices = @transform_5, window_bounds = array<i64: 1, 8, 1>}]} {
    %c0 = arith.constant 0 : index
    %c0_0 = arith.constant 0 : index
    %c0_1 = arith.constant 0 : index
    %0 = vector.load %arg1[%c0, %c0_0, %c0_1] : memref<1x8x128xf32, #tpu.memory_space<vmem>>, vector<1x8x128xf32>
    %1 = vector.shape_cast %0 : vector<1x8x128xf32> to vector<8x128xf32>
    %cst = arith.constant dense<0.000000e+00> : vector<8xf32>
    %2 = vector.multi_reduction <add>, %1, %cst [1] : vector<8x128xf32> to vector<8xf32>
    %3 = vector.shape_cast %2 : vector<8xf32> to vector<8x1xf32>
    %cst_2 = arith.constant 1.280000e+02 : f32
    %4 = vector.broadcast %cst_2 : f32 to vector<8x1xf32>
    %5 = arith.divf %3, %4 : vector<8x1xf32>
    %6 = vector.broadcast %5 : vector<8x1xf32> to vector<8x128xf32>
    %7 = arith.subf %1, %6 : vector<8x128xf32>
    %8 = arith.mulf %7, %7 : vector<8x128xf32>
    %cst_3 = arith.constant dense<0.000000e+00> : vector<8xf32>
    %9 = vector.multi_reduction <add>, %8, %cst_3 [1] : vector<8x128xf32> to vector<8xf32>
    %10 = vector.shape_cast %9 : vector<8xf32> to vector<8x1xf32>
    %cst_4 = arith.constant 1.280000e+02 : f32
    %11 = vector.broadcast %cst_4 : f32 to vector<8x1xf32>
    %12 = arith.divf %10, %11 : vector<8x1xf32>
    %13 = vector.broadcast %5 : vector<8x1xf32> to vector<8x128xf32>
    %14 = arith.subf %1, %13 : vector<8x128xf32>
    %cst_5 = arith.constant 9.99999974E-6 : f32
    %15 = vector.broadcast %cst_5 : f32 to vector<8x1xf32>
    %16 = arith.addf %12, %15 : vector<8x1xf32>
    %17 = math.rsqrt %16 : vector<8x1xf32>
    %18 = vector.broadcast %17 : vector<8x1xf32> to vector<8x128xf32>
    %19 = arith.mulf %14, %18 : vector<8x128xf32>
    %c0_6 = arith.constant 0 : index
    %c0_7 = arith.constant 0 : index
    %20 = vector.load %arg2[%c0_6, %c0_7] : memref<1x128xf32, #tpu.memory_space<vmem>>, vector<1x128xf32>
    %21 = vector.broadcast %20 : vector<1x128xf32> to vector<8x128xf32>
    %22 = arith.mulf %19, %21 : vector<8x128xf32>
    %c0_8 = arith.constant 0 : index
    %c0_9 = arith.constant 0 : index
    %23 = vector.load %arg3[%c0_8, %c0_9] : memref<1x128xf32, #tpu.memory_space<vmem>>, vector<1x128xf32>
    %24 = vector.broadcast %23 : vector<1x128xf32> to vector<8x128xf32>
    %25 = arith.addf %22, %24 : vector<8x128xf32>
    %c0_10 = arith.constant 0 : index
    %c0_11 = arith.constant 0 : index
    %26 = vector.load %arg4[%c0_10, %c0_11] : memref<1x128xf32, #tpu.memory_space<vmem>>, vector<1x128xf32>
    %27 = vector.broadcast %26 : vector<1x128xf32> to vector<8x128xf32>
    %28 = arith.mulf %25, %27 : vector<8x128xf32>
    %cst_12 = arith.constant dense<0.000000e+00> : vector<8xf32>
    %29 = vector.multi_reduction <add>, %28, %cst_12 [1] : vector<8x128xf32> to vector<8xf32>
    %30 = vector.shape_cast %29 : vector<8xf32> to vector<8x1xf32>
    %c0_13 = arith.constant 0 : index
    %c0_14 = arith.constant 0 : index
    %31 = vector.load %arg5[%c0_13, %c0_14] : memref<1x1xf32, #tpu.memory_space<vmem>>, vector<1x1xf32>
    %32 = vector.broadcast %31 : vector<1x1xf32> to vector<8x1xf32>
    %33 = arith.addf %30, %32 : vector<8x1xf32>
    %c0_15 = arith.constant 0 : index
    %c0_16 = arith.constant 0 : index
    %c0_17 = arith.constant 0 : index
    %34 = vector.load %arg6[%c0_15, %c0_16, %c0_17] : memref<1x8x1xf32, #tpu.memory_space<vmem>>, vector<1x8x1xf32>
    %35 = vector.shape_cast %34 : vector<1x8x1xf32> to vector<8x1xf32>
    %36 = vector.shape_cast %33 : vector<8x1xf32> to vector<1x8x1xf32>
    tpu.vector_store %arg6[%c0_15, %c0_16, %c0_17], %36 {strides = array<i32>} : memref<1x8x1xf32, #tpu.memory_space<vmem>>, vector<1x8x1xf32>,
    return
  }
  func.func @transform_0(%arg0: i32) -> (i32, i32, i32) {
    %c0_i32 = arith.constant 0 : i32
    %c0_i32_0 = arith.constant 0 : i32
    %c0_i32_1 = arith.constant 0 : i32
    return %arg0, %c0_i32, %c0_i32_0 : i32, i32, i32
  }
  func.func @transform_1(%arg0: i32) -> (i32, i32) {
    %c0_i32 = arith.constant 0 : i32
    %c0_i32_0 = arith.constant 0 : i32
    %c0_i32_1 = arith.constant 0 : i32
    return %c0_i32, %c0_i32_0 : i32, i32
  }
  func.func @transform_2(%arg0: i32) -> (i32, i32) {
    %c0_i32 = arith.constant 0 : i32
    %c0_i32_0 = arith.constant 0 : i32
    %c0_i32_1 = arith.constant 0 : i32
    return %c0_i32, %c0_i32_0 : i32, i32
  }
  func.func @transform_3(%arg0: i32) -> (i32, i32) {
    %c0_i32 = arith.constant 0 : i32
    %c0_i32_0 = arith.constant 0 : i32
    %c0_i32_1 = arith.constant 0 : i32
    return %c0_i32, %c0_i32_0 : i32, i32
  }
  func.func @transform_4(%arg0: i32) -> (i32, i32) {
    %c0_i32 = arith.constant 0 : i32
    %c0_i32_0 = arith.constant 0 : i32
    %c0_i32_1 = arith.constant 0 : i32
    return %c0_i32, %c0_i32_0 : i32, i32
  }
  func.func @transform_5(%arg0: i32) -> (i32, i32, i32) {
    %c0_i32 = arith.constant 0 : i32
    %c0_i32_0 = arith.constant 0 : i32
    %c0_i32_1 = arith.constant 0 : i32
    return %arg0, %c0_i32, %c0_i32_0 : i32, i32, i32
  }
}

</mosaic_0001>

<bundles_post_ra>
// kernel: forward.8
= control target key start
LH: loop header
LB: loop body
LE: loop exit
PB: predicated region body
PF: predicated region fallthrough
CT: control target
= control target key end

     0   :  { %s541_s15 = smov 0   ;;  %s543_s16 = smov 0   ;;  %s604_s0 = inlined_call_operand.vmem [shape: f32[2,8,128], index: 0, kind: input, shape index: {}]   ;;  %s605_s1 = inlined_call_operand.vmem [shape: bf16[128,128], index: 1, kind: input, shape index: {}]   ;;  %s606_s2 = inlined_call_operand.vmem [shape: f32[1,128], index: 2, kind: input, shape index: {}]   ;;  %s607_s3 = inlined_call_operand.vmem [shape: f32[8,128], index: 3, kind: input, shape index: {}]   ;;  %s608_s4 = inlined_call_operand.vmem [shape: f32[2,8,128], index: 4, kind: output, shape index: {}]  }
   0x1   :  { %s545_s17 = smov 0  }
   0x2 LB: > { %s26_s18 = sadd.s32 1, %s510_s16  ;;  %p422_p0 = scmp.ge.s32.totalorder %s514_s17, 1  ;;  %s514_s17 = sphi %s545_s17, %s14_s17   ;;  %s510_s16 = sphi %s543_s16, %s610_s16   ;;  %s506_s15 = sphi %s541_s15, %s609_s15  }
   0x3   : > { %p28_p1 = scmp.ge.s32.totalorder %s26_s18, 2  ;;  %p189_p2 = scmp.lt.s32.totalorder %s514_s17, 3 }
   0x5   : > { %s612_s18 = smov (%p28_p1, %s26_s18), 0  ;;  %p190_p3 = pnand %p422_p0, %p189_p2 }
   0x6   : > { %p223_p4 = scmp.lt.s32.totalorder (!%p190_p3), %s506_s15, 1 }
   0x7   : > { %193 = sbr.rel (%p190_p3) target bundleno = 178 (0xb2), region = 36 }
   0xc   : > { %v466_v0 = vld [vmem:[%s605_s1 + $0x38] sm:$0xff]  ;;  %v465_v1 = vld [vmem:[%s605_s1 + $0x30] sm:$0xff]  ;;  %v464_v2 = vld [vmem:[%s605_s1 + $0x28] sm:$0xff]  ;;  %s614_s15 = smov (!%p223_p4, %s506_s15), 1 }
   0xd   : > { %311 = vmatpush.bf16.msra.mxu0 %v466_v0  ;;  %v463_v3 = vld [vmem:[%s605_s1 + $0x20] sm:$0xff]  ;;  %v462_v4 = vld [vmem:[%s605_s1 + $0x18] sm:$0xff]  ;;  %v461_v5 = vld [vmem:[%s605_s1 + $0x10] sm:$0xff]  ;;  %s423_s5 = sshll.u32 %s614_s15, 3 }
   0xe   : > { %v460_v6 = vld [vmem:[%s605_s1 + $0x8] sm:$0xff]  ;;  %s229_s10 = scalar_lea.vmem %s604_s0, %s423_s5  ;;  %v459_v7 = vld [vmem:[%s605_s1] sm:$0xff]  ;;  %s240_s22 = scalar_lea.vmem %s608_s4, %s423_s5 }
   0xf   : > { %v241_v8 = vld [vmem:[%s229_s10] sm:$0xff] }
  0x10   : > { %v242_v9 = vpack.c.bf16 %v241_v8, %v241_v8  ;;  %v491_v10 = vld [vmem:[%s606_s2] ss:$0 sm:$0xff] }
  0x11   : > { %312 = vmatpush.bf16.msra.mxu0 %v465_v1  ;;  %v324_v12 = vld [vmem:[%s607_s3] sm:$0xff] }
  0x15   : > { %313 = vmatpush.bf16.msra.mxu0 %v464_v2 }
  0x19   : > { %314 = vmatpush.bf16.msra.mxu0 %v463_v3 }
  0x1d   : > { %315 = vmatpush.bf16.msra.mxu0 %v462_v4 }
  0x21   : > { %316 = vmatpush.bf16.msra.mxu0 %v461_v5 }
  0x25   : > { %317 = vmatpush.bf16.msra.mxu0 %v460_v6 }
  0x29   : > { %318 = vmatpush.bf16.msra.mxu0 %v459_v7 }
  0x2c   : > { %319 = vmatmul.bf16.vlgmr.msra.gmra.mxu0 %v242_v9 }
  0xa9   : > { %v320_v11 = vpop.f32.mrf.mxu0 }
  0xaa   : > { %v321_v13 = vadd.f32 %v491_v10, %v320_v11 }
  0xac   : > { %v325_v14 = vadd.f32 %v324_v12, %v321_v13 }
  0xae   : > { %326 = vst [vmem:[%s240_s22] sm:$0xff] %v325_v14 }
  0xb1   : > { %v322_v15 = vpop.f32.mrf.mxu0 }
  0xb2 PF: > { %s14_s17 = sadd.s32 1, %s514_s17   ;;  %s609_s15 = smov %s510_s16 }
  0xb3   : > { %p11_p5 = scmp.ge.s32.totalorder %s14_s17, 4   ;;  %s610_s16 = smov %s612_s18 }
  0xb5   :  { %13 = sbr.rel (!%p11_p5) target bundleno = 2 (0x2), region = 69 }

// kernel: forward.9
= control target key start
LH: loop header
LB: loop body
LE: loop exit
PB: predicated region body
PF: predicated region fallthrough
CT: control target
= control target key end

     0   :  { %10 = vsyncpa [#allocation3], 0  ;;  %s479_s21 = smov [#allocation2]   ;;  %s480_s23 = smov 192   ;;  %s559_s0 = inlined_call_operand.vmem [shape: f32[16,128], index: 0, kind: input, shape index: {}]   ;;  %s560_s1 = inlined_call_operand.vmem [shape: f32[1,128], index: 1, kind: input, shape index: {}]   ;;  %s561_s2 = inlined_call_operand.vmem [shape: f32[1,128], index: 2, kind: input, shape index: {}]   ;;  %s562_s3 = inlined_call_operand.hbm [shape: bf16[128,384], index: 3, kind: input, shape index: {}]   ;;  %s563_s4 = inlined_call_operand.vmem [shape: f32[1,384], index: 4, kind: input, shape index: {}]   ;;  %s564_s5 = inlined_call_operand.vmem [shape: bf16[16,384], index: 5, kind: output, shape index: {}]  }
   0x1   :  { %s21_s20 = sshll.u32 %s562_s3, 4  ;;  %s23_s22 = sshll.u32 %s479_s21, 4  ;;  %s22_s20 = int_to_ptr.hbm [resolvable:$true] %s21_s20  ;;  %s24_s22 = int_to_ptr.vmem [resolvable:$true] %s23_s22 }
   0x2   :  { %s481_s24 = smov 12  }
   0x3   :  { %29 = dma.hbm_to_vmem [thread:$0]  %s22_s20, 3072, %s24_s22, [#allocation3], %s480_s23, %s480_s23, %s481_s24  }
   0x4   :  { %477 = dma.done.wait [#allocation3], 3072  }
   0x5   :  { %478 = vsyncadd [#allocation3], 4294964224  ;;  %v36_v0 = vld [vmem:[%s559_s0] sm:$0xff]  ;;  %v37_v1 = vld [vmem:[%s559_s0 + $0x8] sm:$0xff]  ;;  %v482_v2 = vmov 128.0  }
   0x6   :  { %38 = vadd.xlane.f32.xlu0 %v36_v0  ;;  %447 = vrcp.f32 %v482_v2  ;;  %v407_v17 = vld [vmem:[#allocation2 + $0xa8] sm:$0xf]  ;;  %v439_v18 = vld [vmem:[#allocation2 + $0xb0] sm:$0xf0]  ;;  %v438_v19 = vld [vmem:[#allocation2 + $0xac] sm:$0xf] }
   0x7   :  { %v408_v20 = vor.u32 %v439_v18, %v407_v17  ;;  %v409_v21 = vld [vmem:[#allocation2 + $0xb4] sm:$0xf0]  ;;  %v415_v22 = vld [vmem:[#allocation2 + $0xb0] sm:$0xf]  ;;  %v440_v23 = vld [vmem:[#allocation2 + $0xb8] sm:$0xf0] }
   0x8   :  { %v412_v24 = vor.u32 %v438_v19, %v409_v21  ;;  %v416_v25 = vor.u32 %v440_v23, %v415_v22  ;;  %v395_v26 = vld [vmem:[#allocation2 + $0x90] sm:$0xf]  ;;  %v436_v27 = vld [vmem:[#allocation2 + $0x98] sm:$0xf0]  ;;  %v435_v28 = vld [vmem:[#allocation2 + $0x94] sm:$0xf] }
   0x9   :  { %266 = vmatpush.bf16.msra.mxu0 %v408_v20  ;;  %v396_v29 = vor.u32 %v436_v27, %v395_v26  ;;  %v397_v30 = vld [vmem:[#allocation2 + $0x9c] sm:$0xf0]  ;;  %v403_v31 = vld [vmem:[#allocation2 + $0x98] sm:$0xf]  ;;  %v437_v32 = vld [vmem:[#allocation2 + $0xa0] sm:$0xf0] }
   0xa   :  { %280 = vmatpush.bf16.msra.mxu1 %v412_v24  ;;  %294 = vmatpush.bf16.msra.mxu2 %v416_v25  ;;  %v400_v33 = vor.u32 %v435_v28, %v397_v30  ;;  %v404_v34 = vor.u32 %v437_v32, %v403_v31  ;;  %v383_v35 = vld [vmem:[#allocation2 + $0x78] sm:$0xf]  ;;  %v433_v36 = vld [vmem:[#allocation2 + $0x80] sm:$0xf0]  ;;  %v432_v37 = vld [vmem:[#allocation2 + $0x7c] sm:$0xf] }
   0xb   :  { %v384_v38 = vor.u32 %v433_v36, %v383_v35  ;;  %v385_v39 = vld [vmem:[#allocation2 + $0x84] sm:$0xf0]  ;;  %v391_v40 = vld [vmem:[#allocation2 + $0x80] sm:$0xf]  ;;  %v434_v41 = vld [vmem:[#allocation2 + $0x88] sm:$0xf0] }
   0xc   :  { %v448_v3 = vpop.eup %447  ;;  %v388_v42 = vor.u32 %v432_v37, %v385_v39  ;;  %v392_v43 = vor.u32 %v434_v41, %v391_v40  ;;  %v371_v44 = vld [vmem:[#allocation2 + $0x60] sm:$0xf]  ;;  %v430_v45 = vld [vmem:[#allocation2 + $0x68] sm:$0xf0]  ;;  %v429_v46 = vld [vmem:[#allocation2 + $0x64] sm:$0xf] }
   0xd   :  { %v43_v4 = vmul.f32 128.0, %v448_v3  ;;  %vm47_vm0 = vweird.f32 %v448_v3  ;;  %267 = vmatpush.bf16.msra.mxu0 %v396_v29  ;;  %v372_v47 = vor.u32 %v430_v45, %v371_v44  ;;  %v373_v48 = vld [vmem:[#allocation2 + $0x6c] sm:$0xf0]  ;;  %v379_v49 = vld [vmem:[#allocation2 + $0x68] sm:$0xf] }
   0xe   :  { %40 = vadd.xlane.f32.xlu0 %v37_v1  ;;  %281 = vmatpush.bf16.msra.mxu1 %v400_v33  ;;  %v431_v50 = vld [vmem:[#allocation2 + $0x70] sm:$0xf0]  ;;  %v376_v51 = vor.u32 %v429_v46, %v373_v48  ;;  %v359_v53 = vld [vmem:[#allocation2 + $0x48] sm:$0xf]  ;;  %v426_v55 = vld [vmem:[#allocation2 + $0x4c] sm:$0xf] }
   0xf   :  { %v44_v5 = vsub.f32 1.0, %v43_v4  ;;  %295 = vmatpush.bf16.msra.mxu2 %v404_v34  ;;  %v380_v52 = vor.u32 %v431_v50, %v379_v49  ;;  %v427_v54 = vld [vmem:[#allocation2 + $0x50] sm:$0xf0]  ;;  %v361_v57 = vld [vmem:[#allocation2 + $0x54] sm:$0xf0] }
  0x10   :  { %v360_v56 = vor.u32 %v427_v54, %v359_v53  ;;  %v367_v58 = vld [vmem:[#allocation2 + $0x50] sm:$0xf]  ;;  %v428_v59 = vld [vmem:[#allocation2 + $0x58] sm:$0xf0]  ;;  %v364_v60 = vor.u32 %v426_v55, %v361_v57  ;;  %v349_v2 = vld [vmem:[#allocation2 + $0x3c] sm:$0xf0] }
  0x11   :  { %v45_v6 = vmul.f32 %v448_v3, %v44_v5  ;;  %268 = vmatpush.bf16.msra.mxu0 %v384_v38  ;;  %v368_v61 = vor.u32 %v428_v59, %v367_v58  ;;  %v347_v62 = vld [vmem:[#allocation2 + $0x30] sm:$0xf]  ;;  %v424_v63 = vld [vmem:[#allocation2 + $0x38] sm:$0xf0]  ;;  %v425_v4 = vld [vmem:[#allocation2 + $0x40] sm:$0xf0] }
  0x12   :  { %282 = vmatpush.bf16.msra.mxu1 %v388_v42  ;;  %v323_v19 = vld [vmem:[#allocation2] sm:$0xf]  ;;  %v418_v20 = vld [vmem:[#allocation2 + $0x8] sm:$0xf0]  ;;  %v417_v21 = vld [vmem:[#allocation2 + $0x4] sm:$0xf] }
  0x13   :  { %v46_v7 = vadd.f32 %v448_v3, %v45_v6  ;;  %296 = vmatpush.bf16.msra.mxu2 %v392_v43  ;;  %v324_v23 = vor.u32 %v418_v20, %v323_v19  ;;  %v325_v24 = vld [vmem:[#allocation2 + $0xc] sm:$0xf0]  ;;  %v331_v25 = vld [vmem:[#allocation2 + $0x8] sm:$0xf]  ;;  %v419_v26 = vld [vmem:[#allocation2 + $0x10] sm:$0xf0] }
  0x14   :  { %v328_v28 = vor.u32 %v417_v21, %v325_v24  ;;  %v332_v29 = vor.u32 %v419_v26, %v331_v25  ;;  %v445_v46 = vld [vmem:[%s560_s1] ss:$0 sm:$0xff] }
  0x15   :  { %v522_v8 = vsel %vm47_vm0, %v448_v3, %v46_v7  ;;  %269 = vmatpush.bf16.msra.mxu0 %v372_v47  ;;  %v355_v3 = vld [vmem:[#allocation2 + $0x38] sm:$0xf] }
  0x16   :  { %283 = vmatpush.bf16.msra.mxu1 %v376_v51  ;;  %v356_v6 = vor.u32 %v425_v4, %v355_v3  ;;  %v335_v7 = vld [vmem:[#allocation2 + $0x18] sm:$0xf]  ;;  %v446_v51 = vld [vmem:[%s561_s2] ss:$0 sm:$0xff] }
  0x17   :  { %297 = vmatpush.bf16.msra.mxu2 %v380_v52 }
  0x19   :  { %270 = vmatpush.bf16.msra.mxu0 %v360_v56 }
  0x1a   :  { %284 = vmatpush.bf16.msra.mxu1 %v364_v60 }
  0x1b   :  { %298 = vmatpush.bf16.msra.mxu2 %v368_v61 }
  0x1f   :  { %299 = vmatpush.bf16.msra.mxu2 %v356_v6 }
  0x79   :  { %v39_v9 = vpop.xlane.xlu0 %38 }
  0x7a   :  { %v49_v10 = vmul.f32 %v522_v8, %v39_v9  ;;  %v421_v9 = vld [vmem:[#allocation2 + $0x20] sm:$0xf0] }
  0x7c   :  { %v525_v11 = vsub.f32 %v36_v0, %v49_v10  ;;  %v423_v0 = vld [vmem:[#allocation2 + $0x34] sm:$0xf]  ;;  %v420_v10 = vld [vmem:[#allocation2 + $0x1c] sm:$0xf] }
  0x7d   :  { %v352_v5 = vor.u32 %v423_v0, %v349_v2 }
  0x7e   :  { %v53_v12 = vmul.f32 %v525_v11, %v525_v11 }
  0x7f   :  { %285 = vmatpush.bf16.msra.mxu1 %v352_v5 }
  0x80   :  { %55 = vadd.xlane.f32.xlu1 %v53_v12  ;;  %v336_v12 = vor.u32 %v421_v9, %v335_v7 }
  0x81   :  { %v41_v13 = vpop.xlane.xlu0 %40 }
  0x82   :  { %v50_v14 = vmul.f32 %v522_v8, %v41_v13  ;;  %v337_v13 = vld [vmem:[#allocation2 + $0x24] sm:$0xf0] }
  0x83   :  { %v340_v17 = vor.u32 %v420_v10, %v337_v13 }
  0x84   :  { %v530_v15 = vsub.f32 %v37_v1, %v50_v14  ;;  %v348_v1 = vor.u32 %v424_v63, %v347_v62  ;;  %v343_v14 = vld [vmem:[#allocation2 + $0x20] sm:$0xf] }
  0x85   :  { %286 = vmatpush.bf16.msra.mxu1 %v340_v17 }
  0x86   :  { %v54_v16 = vmul.f32 %v530_v15, %v530_v15  ;;  %271 = vmatpush.bf16.msra.mxu0 %v348_v1 }
  0x88   :  { %57 = vadd.xlane.f32.xlu1 %v54_v16  ;;  %v422_v16 = vld [vmem:[#allocation2 + $0x28] sm:$0xf0] }
  0x89   :  { %v344_v18 = vor.u32 %v422_v16, %v343_v14  ;;  %287 = vmatpush.bf16.msra.mxu1 %v328_v28 }
  0x8a   :  { %272 = vmatpush.bf16.msra.mxu0 %v336_v12 }
  0x8b   :  { %300 = vmatpush.bf16.msra.mxu2 %v344_v18 }
  0x8e   :  { %273 = vmatpush.bf16.msra.mxu0 %v324_v23 }
  0x8f   :  { %301 = vmatpush.bf16.msra.mxu2 %v332_v29 }
  0xf3   :  { %v56_v22 = vpop.xlane.xlu1 %55 }
  0xf4   :  { %v59_v27 = vmul.f32 %v56_v22, %v522_v8 }
  0xf6   :  { %v61_v30 = vadd.f32 1e-05, %v59_v27 }
  0xf8   :  { %449 = vrsqrt.f32 %v61_v30  ;;  %vm69_vm2 = vweird.f32 %v61_v30 }
  0xfb   :  { %v58_v31 = vpop.xlane.xlu1 %57 }
  0xfc   :  { %v60_v32 = vmul.f32 %v58_v31, %v522_v8 }
  0xfe   :  { %v450_v33 = vpop.eup %449  ;;  %v62_v34 = vadd.f32 1e-05, %v60_v32 }
  0xff   :  { %v64_v35 = vmul.f32 %v450_v33, %v61_v30  ;;  %vm70_vm1 = vweird.f32 %v450_v33 }
 0x100   :  { %451 = vrsqrt.f32 %v62_v34  ;;  %vm71_vm3 = vmor %vm69_vm2, %vm70_vm1  ;;  %vm79_vm5 = vweird.f32 %v62_v34 }
 0x101   :  { %v65_v36 = vmul.f32 %v450_v33, %v64_v35 }
 0x103   :  { %v66_v37 = vmul.f32 0.5, %v65_v36 }
 0x105   :  { %v67_v38 = vsub.f32 1.5, %v66_v37 }
 0x106   :  { %v452_v39 = vpop.eup %451 }
 0x107   :  { %v68_v40 = vmul.f32 %v450_v33, %v67_v38  ;;  %v74_v41 = vmul.f32 %v452_v39, %v62_v34  ;;  %vm80_vm4 = vweird.f32 %v452_v39 }
 0x108   :  { %vm81_vm6 = vmor %vm79_vm5, %vm80_vm4 }
 0x109   :  { %v75_v42 = vmul.f32 %v452_v39, %v74_v41  ;;  %v72_v43 = vsel %vm71_vm3, %v450_v33, %v68_v40 }
 0x10a   :  { %v83_v8 = vmul.f32 %v72_v43, %v525_v11  ;;  %v130_v11 = vld [vmem:[%s563_s4] sm:$0x7] }
 0x10b   :  { %v76_v44 = vmul.f32 0.5, %v75_v42  ;;  %v132_v56 = vperm.slane %v130_v11, 0  ;;  %v133_v57 = vperm.slane %v130_v11, 1  ;;  %v134_v62 = vperm.slane %v130_v11, 2 }
 0x10c   :  { %v89_v50 = vmul.f32 %v445_v46, %v83_v8 }
 0x10d   :  { %v77_v45 = vsub.f32 1.5, %v76_v44 }
 0x10e   :  { %v95_v53 = vadd.f32 %v446_v51, %v89_v50 }
 0x10f   :  { %v78_v47 = vmul.f32 %v452_v39, %v77_v45 }
 0x111   :  { %v82_v48 = vsel %vm81_vm6, %v452_v39, %v78_v47 }
 0x112   :  { %v84_v49 = vmul.f32 %v82_v48, %v530_v15 }
 0x114   :  { %v90_v52 = vmul.f32 %v445_v46, %v84_v49 }
 0x116   :  { %v96_v54 = vadd.f32 %v446_v51, %v90_v52 }
 0x118   :  { %v97_v55 = vpack.c.bf16 %v96_v54, %v95_v53 }
 0x11a   :  { %274 = vmatmul.bf16.vlgmr.msra.gmra.mxu0 %v97_v55  ;;  %288 = vmatmul.bf16.vlgmr.msra.gmra.mxu1 %v97_v55 }
 0x11b   :  { %302 = vmatmul.bf16.vlgmr.msra.gmra.mxu2 %v97_v55 }
 0x197   :  { %v275_v58 = vpop.f32.mrf.mxu0  ;;  %v289_v15 = vpop.f32.mrf.mxu1 }
 0x198   :  { %v276_v59 = vadd.f32 %v275_v58, %v132_v56  ;;  %v290_v60 = vadd.f32 %v289_v15, %v133_v57 }
 0x19a   :  { %v308_v61 = vpack.c.bf16 %v290_v60, %v276_v59 }
 0x19c   :  { %312 = vst [vmem:[%s564_s5] sm:$0xff] %v308_v61 }
 0x19e   :  { %v303_v63 = vpop.f32.mrf.mxu2 }
 0x19f   :  { %v304_v0 = vadd.f32 %v303_v63, %v134_v62  ;;  %v277_v1 = vpop.f32.mrf.mxu0  ;;  %v291_v2 = vpop.f32.mrf.mxu1 }
 0x1a0   :  { %v278_v3 = vadd.f32 %v277_v1, %v132_v56  ;;  %v292_v4 = vadd.f32 %v291_v2, %v133_v57 }
 0x1a1   :  { %v309_v5 = vpack.c.bf16 %v304_v0, %v304_v0 }
 0x1a2   :  { %v310_v6 = vpack.c.bf16 %v292_v4, %v278_v3 }
 0x1a3   :  { %313 = vst [vmem:[%s564_s5 + $0x8] sm:$0xf] %v309_v5 }
 0x1a4   :  { %314 = vst [vmem:[%s564_s5 + $0xc] sm:$0xff] %v310_v6 }
 0x1a6   :  { %v305_v7 = vpop.f32.mrf.mxu2 }
 0x1a7   :  { %v306_v9 = vadd.f32 %v305_v7, %v134_v62 }
 0x1a9   :  { %v311_v10 = vpack.c.bf16 %v306_v9, %v306_v9 }
 0x1ab   :  { %315 = vst [vmem:[%s564_s5 + $0x14] sm:$0xf] %v311_v10 }
 0x1ac   :  { %320 = vsyncpa [#allocation3], 1 }

// kernel: forward.10
= control target key start
LH: loop header
LB: loop body
LE: loop exit
PB: predicated region body
PF: predicated region fallthrough
CT: control target
= control target key end

     0   :  { %s1351_s21 = smov 0   ;;  %s1613_s0 = inlined_call_operand.vmem [shape: bf16[2,8,384], index: 0, kind: input, shape index: {}, may-alias: {0,1,2}]   ;;  %s1614_s1 = inlined_call_operand.vmem [shape: bf16[2,8,384], index: 1, kind: input, shape index: {}, may-alias: {0,1,2}]   ;;  %s1615_s2 = inlined_call_operand.vmem [shape: bf16[2,8,384], index: 2, kind: input, shape index: {}, may-alias: {0,1,2}]   ;;  %s1616_s3 = inlined_call_operand.vmem [shape: f32[2,8,128], index: 3, kind: input, shape index: {}]   ;;  %s1617_s4 = inlined_call_operand.vmem [shape: bf16[128,128], index: 4, kind: input, shape index: {}]   ;;  %s1618_s5 = inlined_call_operand.vmem [shape: f32[1,128], index: 5, kind: input, shape index: {}]   ;;  %s1619_s6 = inlined_call_operand.vmem [shape: f32[2,8,128], index: 6, kind: output, shape index: {}]  }
   0x1 LB: > { %s1210_s22 = sadd.s32 4294967295, %s1309_s21   ;;  %p1214_p0 = scmp.ge.s32.totalorder %s1309_s21, 1  ;;  %s1309_s21 = sphi %s1351_s21, %s16_s21  }
   0x2   : > { %p243_p1 = scmp.lt.s32.totalorder %s1309_s21, 3 }
   0x4   : > { %p244_p2 = pnand %p1214_p0, %p243_p1 }
   0x5   : > { %p288_p3 = scmp.lt.s32.totalorder (!%p244_p2), %s1210_s22, 1  ;;  %s1311_s30 = smov (!%p244_p2), 32  }
   0x6   : > { %247 = sbr.rel (%p244_p2) target bundleno = 851 (0x353), region = 44  ;;  %s1312_s7 = smov (!%p244_p2), 96  }
   0x7   : > { %s1313_s8 = smov (!%p244_p2), 64  }
   0xb   : > { %s1621_s22 = smov (!%p288_p3, %s1210_s22), 1  ;;  %v1314_v4 = vmov 1983009808   ;;  %v1315_v19 = vmov 1934713408   ;;  %vm347_vm0 = vcmask 1047556  }
   0xc   : > { %s1362_s23 = smul.u32 12, %s1621_s22  ;;  %v338_v5 = vunpack.c.l.s4 %v1314_v4  ;;  %v352_v20 = vunpack.c.l.s4 %v1315_v19  ;;  %vm681_vm1 = vcmask 261120   ;;  %vm769_vm3 = vcmask 64512  }
   0xd   : > { %vm813_vm4 = vcmask 1043456   ;;  %vm1019_vm5 = vcmask 523264   ;;  %vm1021_vm6 = vcmask 785408  }
   0xe   : > { %s1158_s26 = scalar_lea.vmem %s1614_s1, %s1362_s23  ;;  %s292_s29 = scalar_lea.vmem %s1613_s0, %s1362_s23  ;;  %v1378_v13 = vunpack.c.0.s8 %v338_v5  ;;  %v1384_v33 = vunpack.c.0.s8 %v352_v20 }
   0xf   : > { %v1220_v0 = vld [vmem:[%s1158_s26 + $0x4] sm:$0xf]  ;;  %v314_v1 = vld [vmem:[%s292_s29] sm:$0xf]  ;;  %s1162_s11 = scalar_lea.vmem %s1615_s2, %s1362_s23 }
  0x10   : > { %444 = vrot.lane.b32.xlu1 %v1220_v0, %s1311_s30  ;;  %440 = vrot.lane.b32.xlu0 %v1220_v0, %s1312_s7  ;;  %v449_v8 = vshrl.u32 %v1220_v0, 16  ;;  %v327_v21 = vshrl.u32 %v314_v1, 16 }
  0x11   : > { %320 = vrot.lane.b32.xlu2 %v314_v1, %s1313_s8 }
  0x18   : > { %442 = vrot.lane.b32.xlu0 %v1220_v0, %s1313_s8  ;;  %318 = vrot.lane.b32.xlu1 %v314_v1, %s1312_s7 }
  0x19   : > { %322 = vrot.lane.b32.xlu2 %v314_v1, %s1311_s30 }
  0x6b   : > { %v321_v2 = vpop.permute.xlu2 %320 }
  0x6c   : > { %v333_v9 = vshrl.u32 %v321_v2, 16 }
  0x73   : > { %v323_v3 = vpop.permute.xlu2 %322 }
  0x74   : > { %v332_v10 = vpack.i.b16 %v323_v3, %v321_v2  ;;  %v334_v11 = vshrl.u32 %v323_v3, 16 }
  0x76   : > { %v335_v16 = vpack.i.b16 %v334_v11, %v333_v9  ;;  %v345_v17 = vperm.slane %v332_v10, %v1378_v13 }
  0x78   : > { %v346_v25 = vrot.slane %v345_v17, 4  ;;  %v372_v26 = vperm.slane %v335_v16, %v1378_v13 }
  0x7a   : > { %v373_v39 = vrot.slane %v372_v26, 4 }
  0x82   : > { %v445_v6 = vpop.permute.xlu1 %444  ;;  %v441_v7 = vpop.permute.xlu0 %440 }
  0x83   : > { %v450_v12 = vshrl.u32 %v441_v7, 16  ;;  %v448_v14 = vpack.i.b16 %v441_v7, %v1220_v0  ;;  %v456_v22 = vshrl.u32 %v445_v6, 16 }
  0x85   : > { %v451_v15 = vpack.i.b16 %v450_v12, %v449_v8  ;;  %v462_v18 = vperm.slane %v448_v14, %v1378_v13 }
  0x87   : > { %v488_v23 = vperm.slane %v451_v15, %v1378_v13  ;;  %v470_v32 = vrot.slane %v462_v18, 4 }
  0x89   : > { %v496_v38 = vrot.slane %v488_v23, 4 }
  0x8a   : > { %v443_v24 = vpop.permute.xlu0 %442  ;;  %v319_v27 = vpop.permute.xlu1 %318 }
  0x8b   : > { %v454_v28 = vpack.i.b16 %v445_v6, %v443_v24  ;;  %v455_v29 = vshrl.u32 %v443_v24, 16  ;;  %v326_v30 = vpack.i.b16 %v319_v27, %v314_v1  ;;  %v328_v31 = vshrl.u32 %v319_v27, 16 }
  0x8d   : > { %v457_v34 = vpack.i.b16 %v456_v22, %v455_v29  ;;  %v467_v35 = vperm.slane %v454_v28, %v1378_v13  ;;  %v329_v36 = vpack.i.b16 %v328_v31, %v327_v21  ;;  %v340_v37 = vperm.slane %v326_v30, %v1378_v13  ;;  %v1427_v28 = vld [vmem:[%s1162_s11 + $0x8] sm:$0xf] }
  0x8e   : > { %561 = vrot.lane.b32.xlu0 %v1427_v28, %s1312_s7  ;;  %563 = vrot.lane.b32.xlu1 %v1427_v28, %s1313_s8 }
  0x8f   : > { %v468_v40 = vrot.slane %v467_v35, 4  ;;  %v471_v41 = vsel %vm347_vm0, %v467_v35, %v470_v32  ;;  %v493_v42 = vperm.slane %v457_v34, %v1378_v13  ;;  %v348_v43 = vsel %vm347_vm0, %v346_v25, %v340_v37  ;;  %565 = vrot.lane.b32.xlu2 %v1427_v28, %s1311_s30 }
  0x90   : > { %v479_v44 = vperm.slane %v471_v41, %v1384_v33  ;;  %v349_v45 = vrot.slane %v340_v37, 4  ;;  %v354_v46 = vperm.slane %v348_v43, %v1384_v33  ;;  %v367_v50 = vperm.slane %v329_v36, %v1378_v13 }
  0x91   : > { %v469_v47 = vsel %vm347_vm0, %v468_v40, %v462_v18  ;;  %v494_v48 = vrot.slane %v493_v42, 4  ;;  %v497_v49 = vsel %vm347_vm0, %v493_v42, %v496_v38 }
  0x92   : > { %v475_v51 = vperm.slane %v469_v47, %v1384_v33  ;;  %v482_v52 = vrot.slane %v479_v44, 4  ;;  %v505_v53 = vperm.slane %v497_v49, %v1384_v33  ;;  %v350_v54 = vsel %vm347_vm0, %v345_v17, %v349_v45 }
  0x93   : > { %v495_v55 = vsel %vm347_vm0, %v494_v48, %v488_v23  ;;  %v358_v56 = vperm.slane %v350_v54, %v1384_v33  ;;  %v374_v57 = vsel %vm347_vm0, %v373_v39, %v367_v50  ;;  %v359_v63 = vrot.slane %v354_v46, 4 }
  0x94   : > { %v480_v58 = vrot.slane %v475_v51, 4  ;;  %v483_v59 = vsel %vm347_vm0, 0, %v482_v52  ;;  %v501_v60 = vperm.slane %v495_v55, %v1384_v33  ;;  %v508_v61 = vrot.slane %v505_v53, 4 }
  0x95   : > { %v515_v62 = vrot.slane %v483_v59, 4  ;;  %v361_v0 = vrot.slane %v358_v56, 4  ;;  %v375_v1 = vrot.slane %v367_v50, 4  ;;  %v380_v5 = vperm.slane %v374_v57, %v1384_v33 }
  0x96   : > { %v481_v2 = vsel %vm347_vm0, 0, %v480_v58  ;;  %v506_v3 = vrot.slane %v501_v60, 4  ;;  %v509_v4 = vsel %vm347_vm0, 0, %v508_v61  ;;  %v360_v12 = vsel %vm347_vm0, 0, %v359_v63 }
  0x97   : > { %v534_v6 = vrot.slane %v509_v4, 4  ;;  %v362_v7 = vsel %vm347_vm0, 0, %v361_v0  ;;  %v376_v8 = vsel %vm347_vm0, %v372_v26, %v375_v1  ;;  %v510_v14 = vsel %vm347_vm0, %v482_v52, %v475_v51 }
  0x98   : > { %v384_v9 = vperm.slane %v376_v8, %v1384_v33  ;;  %v394_v10 = vrot.slane %v362_v7, 4  ;;  %v507_v11 = vsel %vm347_vm0, 0, %v506_v3  ;;  %v516_v15 = vsel %vm347_vm0, %v515_v62, %v481_v2 }
  0x99   : > { %v535_v16 = vsel %vm347_vm0, %v534_v6, %v507_v11  ;;  %v385_v17 = vrot.slane %v380_v5, 4  ;;  %v520_v19 = vperm.slane %v516_v15, %v1378_v13  ;;  %v529_v20 = vsel %vm347_vm0, %v508_v61, %v501_v60 }
  0x9a   : > { %v387_v18 = vrot.slane %v384_v9, 4  ;;  %v389_v21 = vsel %vm347_vm0, %v361_v0, %v354_v46  ;;  %v539_v22 = vperm.slane %v535_v16, %v1378_v13  ;;  %v395_v23 = vsel %vm347_vm0, %v394_v10, %v360_v12 }
  0x9b   : > { %v514_v25 = vperm.slane %v510_v14, %v1378_v13  ;;  %v521_v26 = vrot.slane %v520_v19, 4  ;;  %v399_v27 = vperm.slane %v395_v23, %v1378_v13  ;;  %v533_v30 = vperm.slane %v529_v20, %v1378_v13 }
  0x9c   : > { %v388_v24 = vsel %vm347_vm0, 0, %v387_v18  ;;  %v540_v31 = vrot.slane %v539_v22, 4  ;;  %v386_v32 = vsel %vm347_vm0, 0, %v385_v17  ;;  %v393_v35 = vperm.slane %v389_v21, %v1378_v13 }
  0x9d   : > { %v413_v29 = vrot.slane %v388_v24, 4  ;;  %v522_v34 = vsel %vm347_vm0, %v521_v26, %v514_v25  ;;  %v400_v36 = vrot.slane %v399_v27, 4  ;;  %v408_v42 = vsel %vm347_vm0, %v387_v18, %v380_v5 }
  0x9e   : > { %v526_v37 = vperm.slane %v522_v34, %v1384_v33  ;;  %v541_v38 = vsel %vm347_vm0, %v540_v31, %v533_v30  ;;  %v412_v52 = vperm.slane %v408_v42, %v1378_v13  ;;  %v758_v14 = vlaneseq }
  0x9f   : > { %v414_v39 = vsel %vm347_vm0, %v413_v29, %v386_v32  ;;  %v545_v40 = vperm.slane %v541_v38, %v1384_v33  ;;  %v401_v41 = vsel %vm347_vm0, %v400_v36, %v393_v35  ;;  %v570_v15 = vshrl.u32 %v1427_v28, 16 }
  0xa0   : > { %v418_v43 = vperm.slane %v414_v39, %v1378_v13  ;;  %v551_v44 = vshrl.u32 %v526_v37, 16  ;;  %v527_v45 = vrot.slane %v526_v37, 4  ;;  %v405_v46 = vperm.slane %v401_v41, %v1384_v33 }
  0xa1   : > { %v550_v47 = vpack.i.b16 %v545_v40, %v526_v37  ;;  %v552_v48 = vshrl.u32 %v545_v40, 16  ;;  %v546_v49 = vrot.slane %v545_v40, 4  ;;  %v1464_v22 = vshrl.u32 %v758_v14, 7 }
  0xa2   : > { %v419_v50 = vrot.slane %v418_v43, 4  ;;  %v528_v51 = vsel %vm347_vm0, 0, %v527_v45  ;;  %v406_v62 = vrot.slane %v405_v46, 4  ;;  %v430_v11 = vshrl.u32 %v405_v46, 16 }
  0xa3   : > { %v686_v53 = vsel %vm681_vm1, %v550_v47, 0  ;;  %v553_v54 = vpack.i.b16 %v552_v48, %v551_v44  ;;  %v547_v55 = vsel %vm347_vm0, 0, %v546_v49  ;;  %v557_v57 = vshrl.u32 %v528_v51, 16 }
  0xa4   : > { %695 = vmatpush.bf16.xpose.msra.mxu1 %v686_v53  ;;  %v556_v56 = vpack.i.b16 %v547_v55, %v528_v51  ;;  %v558_v58 = vshrl.u32 %v547_v55, 16  ;;  %v420_v59 = vsel %vm347_vm0, %v419_v50, %v412_v52  ;;  %v407_v4 = vsel %vm347_vm0, 0, %v406_v62 }
  0xa5   : > { %v705_v60 = vsel %vm681_vm1, %v553_v54, 0  ;;  %v424_v61 = vperm.slane %v420_v59, %v1384_v33  ;;  %v436_v8 = vshrl.u32 %v407_v4, 16  ;;  %v1466_v23 = vand.u32 127, %v758_v14 }
  0xa6   : > { %v724_v63 = vsel %vm681_vm1, %v556_v56, 0  ;;  %v559_v0 = vpack.i.b16 %v558_v58, %v557_v57 }
  0xa7   : > { %733 = vmatpush.bf16.xpose.msra.mxu2 %v724_v63  ;;  %v425_v1 = vrot.slane %v424_v61, 4  ;;  %v429_v3 = vpack.i.b16 %v424_v61, %v405_v46  ;;  %v431_v10 = vshrl.u32 %v424_v61, 16  ;;  %vm762_vm2 = vcmp.le.s32.totalorder %v1466_v23, %v1464_v22 }
  0xa8   : > { %v743_v2 = vsel %vm681_vm1, %v559_v0, 0 }
  0xa9   : > { %752 = vmatpush.bf16.xpose.msra.mxu3 %v743_v2  ;;  %v426_v5 = vsel %vm347_vm0, 0, %v425_v1  ;;  %v432_v12 = vpack.i.b16 %v431_v10, %v430_v11 }
  0xaa   : > { %v437_v6 = vshrl.u32 %v426_v5, 16  ;;  %v435_v7 = vpack.i.b16 %v426_v5, %v407_v4 }
  0xab   : > { %1222 = vmatmul.msk.bf16.vlgmr.msra.gmra.mxu1 %vm681_vm1, %v429_v3 }
  0xac   : > { %714 = vmatpush.bf16.xpose.msrb.mxu1 %v705_v60  ;;  %v438_v9 = vpack.i.b16 %v437_v6, %v436_v8 }
  0xae   : > { %1224 = vmatmul.msk.bf16.vlgmr.msra.gmra.mxu2 %vm681_vm1, %v435_v7 }
  0xb0   : > { %1225 = vmatmul.msk.bf16.vlgmr.msra.gmra.mxu3 %vm681_vm1, %v438_v9 }
  0xbb   : > { %1223 = vmatmul.msk.bf16.vlgmr.msrb.gmra.mxu1 %vm681_vm1, %v432_v12 }
  0xe9   : > { %v566_v17 = vpop.permute.xlu2 %565 }
  0xea   : > { %v577_v20 = vshrl.u32 %v566_v17, 16 }
 0x100   : > { %v562_v16 = vpop.permute.xlu0 %561  ;;  %v564_v21 = vpop.permute.xlu1 %563 }
 0x101   : > { %v569_v18 = vpack.i.b16 %v562_v16, %v1427_v28  ;;  %v571_v19 = vshrl.u32 %v562_v16, 16  ;;  %v575_v24 = vpack.i.b16 %v566_v17, %v564_v21  ;;  %v576_v25 = vshrl.u32 %v564_v21, 16 }
 0x103   : > { %v572_v26 = vpack.i.b16 %v571_v19, %v570_v15  ;;  %v583_v27 = vperm.slane %v569_v18, %v1378_v13  ;;  %v578_v29 = vpack.i.b16 %v577_v20, %v576_v25  ;;  %v588_v30 = vperm.slane %v575_v24, %v1378_v13 }
 0x105   : > { %v591_v31 = vrot.slane %v583_v27, 4  ;;  %v609_v32 = vperm.slane %v572_v26, %v1378_v13  ;;  %v589_v28 = vrot.slane %v588_v30, 4  ;;  %v614_v34 = vperm.slane %v578_v29, %v1378_v13 }
 0x107   : > { %v617_v35 = vrot.slane %v609_v32, 4  ;;  %v592_v36 = vsel %vm347_vm0, %v588_v30, %v591_v31  ;;  %v590_v38 = vsel %vm347_vm0, %v589_v28, %v583_v27  ;;  %v615_v40 = vrot.slane %v614_v34, 4 }
 0x108   : > { %v600_v39 = vperm.slane %v592_v36, %v1384_v33  ;;  %v596_v42 = vperm.slane %v590_v38, %v1384_v33 }
 0x109   : > { %v618_v43 = vsel %vm347_vm0, %v614_v34, %v617_v35  ;;  %v616_v46 = vsel %vm347_vm0, %v615_v40, %v609_v32 }
 0x10a   : > { %v603_v45 = vrot.slane %v600_v39, 4  ;;  %v626_v47 = vperm.slane %v618_v43, %v1384_v33  ;;  %v601_v48 = vrot.slane %v596_v42, 4  ;;  %v622_v49 = vperm.slane %v616_v46, %v1384_v33 }
 0x10c   : > { %v604_v50 = vsel %vm347_vm0, 0, %v603_v45  ;;  %v629_v51 = vrot.slane %v626_v47, 4  ;;  %v602_v52 = vsel %vm347_vm0, 0, %v601_v48  ;;  %v627_v53 = vrot.slane %v622_v49, 4 }
 0x10d   : > { %v636_v54 = vrot.slane %v604_v50, 4  ;;  %v631_v55 = vsel %vm347_vm0, %v603_v45, %v596_v42 }
 0x10e   : > { %v630_v56 = vsel %vm347_vm0, 0, %v629_v51  ;;  %v628_v58 = vsel %vm347_vm0, 0, %v627_v53  ;;  %v650_v60 = vsel %vm347_vm0, %v629_v51, %v622_v49  ;;  %v635_v62 = vperm.slane %v631_v55, %v1378_v13 }
 0x10f   : > { %v655_v57 = vrot.slane %v630_v56, 4  ;;  %v637_v59 = vsel %vm347_vm0, %v636_v54, %v602_v52  ;;  %v654_v4 = vperm.slane %v650_v60, %v1378_v13 }
 0x110   : > { %v641_v63 = vperm.slane %v637_v59, %v1378_v13 }
 0x111   : > { %v656_v1 = vsel %vm347_vm0, %v655_v57, %v628_v58 }
 0x112   : > { %v642_v3 = vrot.slane %v641_v63, 4  ;;  %v660_v5 = vperm.slane %v656_v1, %v1378_v13 }
 0x114   : > { %v643_v9 = vsel %vm347_vm0, %v642_v3, %v635_v62  ;;  %v661_v10 = vrot.slane %v660_v5, 4 }
 0x115   : > { %v647_v12 = vperm.slane %v643_v9, %v1384_v33 }
 0x116   : > { %v662_v14 = vsel %vm347_vm0, %v661_v10, %v654_v4 }
 0x117   : > { %v666_v15 = vperm.slane %v662_v14, %v1384_v33  ;;  %v672_v16 = vshrl.u32 %v647_v12, 16  ;;  %v648_v17 = vrot.slane %v647_v12, 4 }
 0x119   : > { %v671_v21 = vpack.i.b16 %v666_v15, %v647_v12  ;;  %v673_v24 = vshrl.u32 %v666_v15, 16  ;;  %v649_v25 = vsel %vm347_vm0, 0, %v648_v17  ;;  %v667_v27 = vrot.slane %v666_v15, 4 }
 0x11a   : > { %v678_v32 = vshrl.u32 %v649_v25, 16 }
 0x11b   : > { %v815_v30 = vsel %vm813_vm4, %v671_v21, 0  ;;  %v674_v31 = vpack.i.b16 %v673_v24, %v672_v16  ;;  %v668_v28 = vsel %vm347_vm0, 0, %v667_v27 }
 0x11c   : > { %824 = vmatpush.bf16.msra.mxu0 %v815_v30  ;;  %v677_v23 = vpack.i.b16 %v668_v28, %v649_v25  ;;  %v679_v34 = vshrl.u32 %v668_v28, 16 }
 0x11d   : > { %v834_v22 = vsel %vm813_vm4, %v674_v31, 0 }
 0x11e   : > { %843 = vmatpush.bf16.msra.mxu1 %v834_v22  ;;  %v853_v35 = vsel %vm813_vm4, %v677_v23, 0  ;;  %v680_v36 = vpack.i.b16 %v679_v34, %v678_v32 }
 0x11f   : > { %862 = vmatpush.bf16.msrb.mxu2 %v853_v35 }
 0x120   : > { %v872_v38 = vsel %vm813_vm4, %v680_v36, 0 }
 0x121   : > { %881 = vmatpush.bf16.msrb.mxu3 %v872_v38 }
 0x128   : > { %v697_v37 = vpop.f32.mrf.mxu1 }
 0x129   : > { %v1480_v41 = vsel %vm762_vm2, %v697_v37, -1e+30 }
 0x12a   : > { %v770_v44 = vsel %vm769_vm3, %v1480_v41, -inf }
 0x12b   : > { %771 = vmax.xlane.f32.xlu2 %v770_v44 }
 0x130   : > { %v699_v61 = vpop.f32.mrf.mxu1 }
 0x131   : > { %v735_v0 = vpop.f32.mrf.mxu2 }
 0x132   : > { %v767_v2 = vsel %vm762_vm2, %v735_v0, -1e+30 }
 0x133   : > { %v754_v6 = vpop.f32.mrf.mxu3  ;;  %v776_v7 = vsel %vm769_vm3, %v767_v2, -inf }
 0x134   : > { %v768_v8 = vsel %vm762_vm2, %v754_v6, -1e+30  ;;  %777 = vmax.xlane.f32.xlu0 %v776_v7 }
 0x135   : > { %v779_v11 = vsel %vm769_vm3, %v768_v8, -inf }
 0x136   : > { %780 = vmax.xlane.f32.xlu1 %v779_v11 }
 0x138   : > { %v716_v18 = vpop.f32.mrf.mxu1 }
 0x139   : > { %v766_v19 = vsel %vm762_vm2, %v716_v18, -1e+30  ;;  %v737_v20 = vpop.f32.mrf.mxu2 }
 0x13a   : > { %v773_v26 = vsel %vm769_vm3, %v766_v19, -inf }
 0x13b   : > { %774 = vmax.xlane.f32.xlu2 %v773_v26  ;;  %v756_v29 = vpop.f32.mrf.mxu3 }
 0x140   : > { %v718_v37 = vpop.f32.mrf.mxu1 }
 0x19e   : > { %v772_v39 = vpop.xlane.xlu2 %771 }
 0x19f   : > { %v782_v40 = vsub.f32 %v1480_v41, %v772_v39 }
 0x1a1   : > { %v786_v42 = vmul.f32 1.442695, %v782_v40 }
 0x1a3   : > { %1287 = vpow2.f32 %v786_v42 }
 0x1a7   : > { %v778_v43 = vpop.xlane.xlu0 %777 }
 0x1a8   : > { %v784_v44 = vsub.f32 %v767_v2, %v778_v43 }
 0x1a9   : > { %v1288_v45 = vpop.eup %1287  ;;  %v781_v46 = vpop.xlane.xlu1 %780 }
 0x1aa   : > { %v790_v47 = vmul.f32 1.442695, %v784_v44  ;;  %v785_v48 = vsub.f32 %v768_v8, %v781_v46  ;;  %v794_v49 = vsel %vm769_vm3, %v1288_v45, 0.0  ;;  %v806_v50 = vpack.c.bf16 %v1288_v45, %v1288_v45 }
 0x1ab   : > { %795 = vadd.xlane.f32.xlu1 %v794_v49 }
 0x1ac   : > { %1289 = vpow2.f32 %v790_v47  ;;  %v792_v51 = vmul.f32 1.442695, %v785_v48  ;;  %1226 = vmatmul.msk.bf16.vlgmr.msra.gmra.mxu0 %vm769_vm3, %v806_v50 }
 0x1ae   : > { %1291 = vpow2.f32 %v792_v51  ;;  %v775_v52 = vpop.xlane.xlu2 %774 }
 0x1af   : > { %v783_v53 = vsub.f32 %v766_v19, %v775_v52 }
 0x1b1   : > { %v788_v41 = vmul.f32 1.442695, %v783_v53 }
 0x1b2   : > { %v1290_v54 = vpop.eup %1289 }
 0x1b3   : > { %1293 = vpow2.f32 %v788_v41  ;;  %v800_v55 = vsel %vm769_vm3, %v1290_v54, 0.0  ;;  %v808_v56 = vpack.c.bf16 %v1290_v54, %v1290_v54 }
 0x1b4   : > { %v1292_v57 = vpop.eup %1291  ;;  %801 = vadd.xlane.f32.xlu0 %v800_v55 }
 0x1b5   : > { %1228 = vmatmul.msk.bf16.vlgmr.msrb.gmra.mxu2 %vm769_vm3, %v808_v56  ;;  %v803_v58 = vsel %vm769_vm3, %v1292_v57, 0.0  ;;  %v809_v59 = vpack.c.bf16 %v1292_v57, %v1292_v57 }
 0x1b6   : > { %804 = vadd.xlane.f32.xlu2 %v803_v58 }
 0x1b7   : > { %1229 = vmatmul.msk.bf16.vlgmr.msrb.gmra.mxu3 %vm769_vm3, %v809_v59 }
 0x1b9   : > { %v1294_v60 = vpop.eup %1293 }
 0x1ba   : > { %v807_v61 = vpack.c.bf16 %v1294_v60, %v1294_v60  ;;  %v797_v62 = vsel %vm769_vm3, %v1294_v60, 0.0 }
 0x1bc   : > { %1227 = vmatmul.msk.bf16.vlgmr.msra.gmra.mxu1 %vm769_vm3, %v807_v61  ;;  %798 = vadd.xlane.f32.xlu0 %v797_v62 }
 0x21e   : > { %v796_v1 = vpop.xlane.xlu1 %795 }
 0x21f   : > { %1295 = vrcp.f32 %v796_v1 }
 0x225   : > { %v1296_v5 = vpop.eup %1295 }
 0x227   : > { %v802_v63 = vpop.xlane.xlu0 %801 }
 0x228   : > { %1297 = vrcp.f32 %v802_v63 }
 0x229   : > { %v826_v0 = vpop.f32.mrf.mxu0  ;;  %v805_v3 = vpop.xlane.xlu2 %804 }
 0x22a   : > { %v891_v6 = vmul.f32 %v1296_v5, %v826_v0 }
 0x22c   : > { %v898_v10 = vrot.slane %v891_v6, 4 }
 0x22e   : > { %v1298_v7 = vpop.eup %1297 }
 0x22f   : > { %v799_v2 = vpop.xlane.xlu0 %798 }
 0x230   : > { %1299 = vrcp.f32 %v799_v2 }
 0x231   : > { %v828_v4 = vpop.f32.mrf.mxu0  ;;  %1301 = vrcp.f32 %v805_v3 }
 0x236   : > { %v1300_v9 = vpop.eup %1299 }
 0x237   : > { %v1302_v14 = vpop.eup %1301 }
 0x238   : > { %v864_v8 = vpop.f32.mrf.mxu2 }
 0x239   : > { %v893_v11 = vmul.f32 %v1298_v7, %v864_v8  ;;  %v845_v12 = vpop.f32.mrf.mxu1 }
 0x23a   : > { %v892_v15 = vmul.f32 %v1300_v9, %v845_v12  ;;  %v883_v16 = vpop.f32.mrf.mxu3 }
 0x23b   : > { %v895_v17 = vrot.slane %v893_v11, 4  ;;  %v899_v18 = vsel %vm347_vm0, %v893_v11, %v898_v10  ;;  %v894_v19 = vmul.f32 %v1302_v14, %v883_v16 }
 0x23c   : > { %v907_v20 = vperm.slane %v899_v18, %v1378_v13  ;;  %v910_v21 = vrot.slane %v892_v15, 4 }
 0x23d   : > { %v897_v24 = vsel %vm347_vm0, %v895_v17, %v891_v6  ;;  %v908_v25 = vrot.slane %v894_v19, 4 }
 0x23e   : > { %v903_v26 = vperm.slane %v897_v24, %v1378_v13  ;;  %v934_v27 = vrot.slane %v907_v20, 4  ;;  %v911_v29 = vsel %vm347_vm0, %v894_v19, %v910_v21  ;;  %v1270_v19 = vld [vmem:[%s1617_s4 + $0x30] sm:$0xff]  ;;  %v1268_v21 = vld [vmem:[%s1617_s4 + $0x20] sm:$0xff]  ;;  %v1267_v24 = vld [vmem:[%s1617_s4 + $0x18] sm:$0xff] }
 0x23f   : > { %v909_v30 = vsel %vm347_vm0, %v908_v25, %v892_v15  ;;  %v919_v31 = vperm.slane %v911_v29, %v1378_v13  ;;  %v1266_v25 = vld [vmem:[%s1617_s4 + $0x10] sm:$0xff] }
 0x240   : > { %v922_v32 = vrot.slane %v903_v26, 4  ;;  %v915_v28 = vperm.slane %v909_v30, %v1378_v13  ;;  %v866_v22 = vpop.f32.mrf.mxu2 }
 0x241   : > { %v932_v23 = vrot.slane %v919_v31, 4  ;;  %v935_v34 = vsel %vm347_vm0, %v919_v31, %v934_v27  ;;  %v847_v35 = vpop.f32.mrf.mxu1  ;;  %v1264_v27 = vld [vmem:[%s1617_s4] sm:$0xff] }
 0x242   : > { %v920_v36 = vrot.slane %v915_v28, 4  ;;  %v923_v37 = vsel %vm347_vm0, %v915_v28, %v922_v32  ;;  %v943_v38 = vperm.slane %v935_v34, %v1384_v33  ;;  %v885_v39 = vpop.f32.mrf.mxu3  ;;  %v1286_v35 = vld [vmem:[%s1618_s5] ss:$0 sm:$0xff] }
 0x243   : > { %v931_v40 = vperm.slane %v923_v37, %v1384_v33  ;;  %v933_v42 = vsel %vm347_vm0, %v932_v23, %v907_v20  ;;  %v1269_v20 = vld [vmem:[%s1617_s4 + $0x28] sm:$0xff] }
 0x244   : > { %v921_v43 = vsel %vm347_vm0, %v920_v36, %v903_v26  ;;  %v939_v44 = vperm.slane %v933_v42, %v1384_v33  ;;  %v950_v45 = vrot.slane %v943_v38, 4  ;;  %v1265_v26 = vld [vmem:[%s1617_s4 + $0x8] sm:$0xff] }
 0x245   : > { %v927_v46 = vperm.slane %v921_v43, %v1384_v33  ;;  %v946_v47 = vrot.slane %v931_v40, 4 }
 0x246   : > { %v948_v48 = vrot.slane %v939_v44, 4  ;;  %v951_v49 = vsel %vm347_vm0, 0.0, %v950_v45  ;;  %v963_v50 = vsel %vm347_vm0, %v950_v45, %v939_v44 }
 0x247   : > { %v947_v51 = vsel %vm347_vm0, 0.0, %v946_v47  ;;  %v968_v52 = vrot.slane %v951_v49, 4  ;;  %v944_v53 = vrot.slane %v927_v46, 4  ;;  %v952_v41 = vsel %vm347_vm0, %v946_v47, %v927_v46 }
 0x248   : > { %v957_v54 = vrot.slane %v947_v51, 4  ;;  %v949_v55 = vsel %vm347_vm0, 0.0, %v948_v48  ;;  %v956_v56 = vperm.slane %v952_v41, %v1378_v13  ;;  %v967_v57 = vperm.slane %v963_v50, %v1378_v13 }
 0x249   : > { %v945_v58 = vsel %vm347_vm0, 0.0, %v944_v53  ;;  %v969_v59 = vsel %vm347_vm0, %v968_v52, %v949_v55 }
 0x24a   : > { %v958_v60 = vsel %vm347_vm0, %v957_v54, %v945_v58  ;;  %v973_v61 = vperm.slane %v969_v59, %v1378_v13  ;;  %v976_v62 = vrot.slane %v956_v56, 4  ;;  %v988_v63 = vrot.slane %v967_v57, 4 }
 0x24b   : > { %v962_v0 = vperm.slane %v958_v60, %v1378_v13 }
 0x24c   : > { %v989_v1 = vsel %vm347_vm0, %v973_v61, %v988_v63  ;;  %v986_v2 = vrot.slane %v973_v61, 4 }
 0x24d   : > { %v977_v3 = vsel %vm347_vm0, %v962_v0, %v976_v62  ;;  %v997_v4 = vperm.slane %v989_v1, %v1384_v33  ;;  %v974_v5 = vrot.slane %v962_v0, 4 }
 0x24e   : > { %v985_v6 = vperm.slane %v977_v3, %v1384_v33  ;;  %v987_v7 = vsel %vm347_vm0, %v986_v2, %v967_v57 }
 0x24f   : > { %v1002_v8 = vrot.slane %v997_v4, 4  ;;  %v975_v9 = vsel %vm347_vm0, %v974_v5, %v956_v56  ;;  %v993_v10 = vperm.slane %v987_v7, %v1384_v33 }
 0x250   : > { %v1004_v11 = vrot.slane %v985_v6, 4  ;;  %v981_v13 = vperm.slane %v975_v9, %v1384_v33  ;;  %v1271_v33 = vld [vmem:[%s1617_s4 + $0x38] sm:$0xff] }
 0x251   : > { %v1003_v12 = vsel %vm347_vm0, %v1002_v8, %v985_v6  ;;  %v998_v14 = vrot.slane %v993_v10, 4  ;;  %1088 = vmatpush.bf16.msrb.mxu0 %v1271_v33 }
 0x252   : > { %1011 = vrot.lane.b32.xlu2 %v1003_v12, %s1313_s8  ;;  %v1005_v15 = vsel %vm347_vm0, %v997_v4, %v1004_v11  ;;  %v1000_v16 = vrot.slane %v981_v13, 4 }
 0x253   : > { %1015 = vrot.lane.b32.xlu0 %v1005_v15, %s1312_s7  ;;  %v999_v17 = vsel %vm347_vm0, %v998_v14, %v981_v13 }
 0x254   : > { %v1001_v18 = vsel %vm347_vm0, %v993_v10, %v1000_v16 }
 0x255   : > { %1007 = vrot.lane.b32.xlu1 %v1001_v18, %s1311_s30  ;;  %1089 = vmatpush.bf16.msrb.mxu0 %v1270_v19  ;;  %s1218_s30 = sshll.u32 %s1621_s22, 3 }
 0x256   : > { %s308_s9 = scalar_lea.vmem %s1616_s3, %s1218_s30  ;;  %s312_s14 = scalar_lea.vmem %s1619_s6, %s1218_s30 }
 0x257   : > { %v1101_v34 = vld [vmem:[%s308_s9] sm:$0xff] }
 0x259   : > { %1090 = vmatpush.bf16.msrb.mxu0 %v1269_v20 }
 0x25d   : > { %1091 = vmatpush.bf16.msrb.mxu0 %v1268_v21 }
 0x261   : > { %1092 = vmatpush.bf16.msrb.mxu0 %v1267_v24 }
 0x265   : > { %1093 = vmatpush.bf16.msrb.mxu0 %v1266_v25 }
 0x269   : > { %1094 = vmatpush.bf16.msrb.mxu0 %v1265_v26 }
 0x26d   : > { %1095 = vmatpush.bf16.msrb.mxu0 %v1264_v27 }
 0x2ac   : > { %v1012_v30 = vpop.permute.xlu2 %1011 }
 0x2c5   : > { %v1016_v32 = vpop.permute.xlu0 %1015 }
 0x2c7   : > { %v1008_v29 = vpop.permute.xlu1 %1007 }
 0x2c8   : > { %v1018_v31 = vsel %vm681_vm1, %v999_v17, %v1008_v29 }
 0x2c9   : > { %v1020_v28 = vsel %vm1019_vm5, %v1018_v31, %v1012_v30 }
 0x2ca   : > { %v1022_v22 = vsel %vm1021_vm6, %v1020_v28, %v1016_v32 }
 0x2cb   : > { %v1023_v23 = vpack.c.bf16 %v1022_v22, %v1022_v22 }
 0x2cd   : > { %1096 = vmatmul.bf16.vlgmr.msrb.gmra.mxu0 %v1023_v23 }
 0x34a   : > { %v1097_v36 = vpop.f32.mrf.mxu0 }
 0x34b   : > { %v1102_v37 = vadd.f32 %v1101_v34, %v1097_v36 }
 0x34d   : > { %v1107_v38 = vadd.f32 %v1286_v35, %v1102_v37 }
 0x34f   : > { %1108 = vst [vmem:[%s312_s14] sm:$0xff] %v1107_v38 }
 0x352   : > { %v1099_v39 = vpop.f32.mrf.mxu0 }
 0x353 PF: > { %s16_s21 = sadd.s32 1, %s1309_s21  }
 0x354   : > { %p13_p4 = scmp.ge.s32.totalorder %s16_s21, 4  }
 0x356   :  { %15 = sbr.rel (!%p13_p4) target bundleno = 1 (0x1), region = 83 }

// kernel: forward.11
= control target key start
LH: loop header
LB: loop body
LE: loop exit
PB: predicated region body
PF: predicated region fallthrough
CT: control target
= control target key end

     0   :  { %12 = vsyncpa [#allocation3], 0  ;;  %s1321_s0 = inlined_call_operand.vmem [shape: f32[16,128], index: 0, kind: input, shape index: {}]   ;;  %s1322_s1 = inlined_call_operand.vmem [shape: f32[1,128], index: 1, kind: input, shape index: {}]   ;;  %s1323_s2 = inlined_call_operand.vmem [shape: f32[1,128], index: 2, kind: input, shape index: {}]   ;;  %s1324_s3 = inlined_call_operand.hbm [shape: bf16[128,512], index: 3, kind: input, shape index: {}]   ;;  %s1325_s4 = inlined_call_operand.vmem [shape: f32[1,512], index: 4, kind: input, shape index: {}]   ;;  %s1326_s5 = inlined_call_operand.hbm [shape: bf16[512,128], index: 5, kind: input, shape index: {}]   ;;  %s1327_s6 = inlined_call_operand.vmem [shape: f32[1,128], index: 6, kind: input, shape index: {}]   ;;  %s1328_s7 = inlined_call_operand.vmem [shape: f32[16,128], index: 7, kind: output, shape index: {}]  }
   0x1   :  { %s24_s26 = sshll.u32 %s1324_s3, 4  ;;  %s25_s26 = int_to_ptr.hbm [resolvable:$true] %s24_s26 }
   0x2   :  { %13 = vsyncpa [#allocation5], 0  ;;  %s1184_s27 = smov [#allocation2]   ;;  %s39_s8 = sshll.u32 %s1326_s5, 4  ;;  %s40_s8 = int_to_ptr.hbm [resolvable:$true] %s39_s8 }
   0x3   :  { %s26_s28 = sshll.u32 %s1184_s27, 4  ;;  %s1185_s9 = smov 256   ;;  %s27_s28 = int_to_ptr.vmem [resolvable:$true] %s26_s28 }
   0x4   :  { %s1186_s10 = smov 16   ;;  %s1187_s11 = smov [#allocation4]  }
   0x5   :  { %32 = dma.hbm_to_vmem [thread:$0]  %s25_s26, 4096, %s27_s28, [#allocation3], %s1185_s9, %s1185_s9, %s1186_s10  }
   0x6   :  { %s41_s12 = sshll.u32 %s1187_s11, 4  ;;  %s1188_s13 = smov 64   ;;  %s42_s12 = int_to_ptr.vmem [resolvable:$true] %s41_s12 }
   0x7   :  { %s1189_s14 = smov 4  }
   0x8   :  { %47 = dma.hbm_to_vmem [thread:$0]  %s40_s8, 4096, %s42_s12, [#allocation5], %s1188_s13, %s1188_s13, %s1189_s14  }
   0x9   :  { %1180 = dma.done.wait [#allocation3], 4096  }
   0xa   :  { %1181 = vsyncadd [#allocation3], 4294963200 }
   0xb   :  { %1182 = dma.done.wait [#allocation5], 4096  }
   0xc   :  { %1183 = vsyncadd [#allocation5], 4294963200  ;;  %v1240_v0 = vld [vmem:[%s1321_s0] sm:$0xff]  ;;  %v1246_v1 = vld [vmem:[%s1321_s0 + $0x8] sm:$0xff]  ;;  %v1190_v2 = vmov 128.0  }
   0xd   :  { %60 = vadd.xlane.f32.xlu0 %v1240_v0  ;;  %1110 = vrcp.f32 %v1190_v2  ;;  %v894_v17 = vld [vmem:[#allocation2 + $0xe0] sm:$0xf]  ;;  %v1066_v18 = vld [vmem:[#allocation2 + $0xec] sm:$0xf0]  ;;  %v1064_v19 = vld [vmem:[#allocation2 + $0xe4] sm:$0xf] }
   0xe   :  { %v895_v20 = vor.u32 %v1066_v18, %v894_v17  ;;  %v896_v21 = vld [vmem:[#allocation2 + $0xf0] sm:$0xf0]  ;;  %v902_v22 = vld [vmem:[#allocation2 + $0xe8] sm:$0xf]  ;;  %v1067_v23 = vld [vmem:[#allocation2 + $0xf4] sm:$0xf0] }
   0xf   :  { %v899_v24 = vor.u32 %v1064_v19, %v896_v21  ;;  %v903_v25 = vor.u32 %v1067_v23, %v902_v22  ;;  %v1065_v26 = vld [vmem:[#allocation2 + $0xec] sm:$0xf]  ;;  %v904_v27 = vld [vmem:[#allocation2 + $0xf8] sm:$0xf0]  ;;  %v878_v29 = vld [vmem:[#allocation2 + $0xc0] sm:$0xf] }
  0x10   :  { %322 = vmatpush.bf16.msra.mxu0 %v895_v20  ;;  %v907_v28 = vor.u32 %v1065_v26, %v904_v27  ;;  %v1062_v30 = vld [vmem:[#allocation2 + $0xcc] sm:$0xf0]  ;;  %v1060_v31 = vld [vmem:[#allocation2 + $0xc4] sm:$0xf]  ;;  %v880_v33 = vld [vmem:[#allocation2 + $0xd0] sm:$0xf0] }
  0x11   :  { %336 = vmatpush.bf16.msra.mxu1 %v899_v24  ;;  %350 = vmatpush.bf16.msra.mxu2 %v903_v25  ;;  %v879_v32 = vor.u32 %v1062_v30, %v878_v29  ;;  %v886_v34 = vld [vmem:[#allocation2 + $0xc8] sm:$0xf]  ;;  %v1063_v35 = vld [vmem:[#allocation2 + $0xd4] sm:$0xf0]  ;;  %v883_v36 = vor.u32 %v1060_v31, %v880_v33  ;;  %v1061_v38 = vld [vmem:[#allocation2 + $0xcc] sm:$0xf] }
  0x12   :  { %364 = vmatpush.bf16.msra.mxu3 %v907_v28  ;;  %v887_v37 = vor.u32 %v1063_v35, %v886_v34  ;;  %v888_v39 = vld [vmem:[#allocation2 + $0xd8] sm:$0xf0]  ;;  %v862_v41 = vld [vmem:[#allocation2 + $0xa0] sm:$0xf]  ;;  %v1058_v42 = vld [vmem:[#allocation2 + $0xac] sm:$0xf0] }
  0x13   :  { %v1111_v3 = vpop.eup %1110  ;;  %v891_v40 = vor.u32 %v1061_v38, %v888_v39  ;;  %v1056_v43 = vld [vmem:[#allocation2 + $0xa4] sm:$0xf]  ;;  %v863_v44 = vor.u32 %v1058_v42, %v862_v41  ;;  %v864_v45 = vld [vmem:[#allocation2 + $0xb0] sm:$0xf0]  ;;  %v870_v46 = vld [vmem:[#allocation2 + $0xa8] sm:$0xf] }
  0x14   :  { %v65_v4 = vmul.f32 128.0, %v1111_v3  ;;  %vm69_vm0 = vweird.f32 %v1111_v3  ;;  %323 = vmatpush.bf16.msra.mxu0 %v879_v32  ;;  %v1059_v47 = vld [vmem:[#allocation2 + $0xb4] sm:$0xf0]  ;;  %v867_v48 = vor.u32 %v1056_v43, %v864_v45  ;;  %v1057_v50 = vld [vmem:[#allocation2 + $0xac] sm:$0xf] }
  0x15   :  { %62 = vadd.xlane.f32.xlu0 %v1246_v1  ;;  %337 = vmatpush.bf16.msra.mxu1 %v883_v36  ;;  %v871_v49 = vor.u32 %v1059_v47, %v870_v46  ;;  %v872_v51 = vld [vmem:[#allocation2 + $0xb8] sm:$0xf0]  ;;  %v846_v53 = vld [vmem:[#allocation2 + $0x80] sm:$0xf]  ;;  %v1054_v54 = vld [vmem:[#allocation2 + $0x8c] sm:$0xf0] }
  0x16   :  { %v66_v5 = vsub.f32 1.0, %v65_v4  ;;  %351 = vmatpush.bf16.msra.mxu2 %v887_v37  ;;  %365 = vmatpush.bf16.msra.mxu3 %v891_v40  ;;  %v875_v52 = vor.u32 %v1057_v50, %v872_v51  ;;  %v1052_v55 = vld [vmem:[#allocation2 + $0x84] sm:$0xf]  ;;  %v847_v56 = vor.u32 %v1054_v54, %v846_v53  ;;  %v848_v57 = vld [vmem:[#allocation2 + $0x90] sm:$0xf0] }
  0x17   :  { %v854_v58 = vld [vmem:[#allocation2 + $0x88] sm:$0xf]  ;;  %v1055_v59 = vld [vmem:[#allocation2 + $0x94] sm:$0xf0]  ;;  %v851_v60 = vor.u32 %v1052_v55, %v848_v57  ;;  %v1053_v62 = vld [vmem:[#allocation2 + $0x8c] sm:$0xf] }
  0x18   :  { %v67_v6 = vmul.f32 %v1111_v3, %v66_v5  ;;  %324 = vmatpush.bf16.msra.mxu0 %v863_v44  ;;  %v855_v61 = vor.u32 %v1055_v59, %v854_v58  ;;  %v856_v63 = vld [vmem:[#allocation2 + $0x98] sm:$0xf0]  ;;  %v1050_v4 = vld [vmem:[#allocation2 + $0x6c] sm:$0xf0]  ;;  %v1048_v5 = vld [vmem:[#allocation2 + $0x64] sm:$0xf] }
  0x19   :  { %338 = vmatpush.bf16.msra.mxu1 %v867_v48  ;;  %v859_v2 = vor.u32 %v1053_v62, %v856_v63  ;;  %v814_v18 = vld [vmem:[#allocation2 + $0x40] sm:$0xf]  ;;  %v1046_v19 = vld [vmem:[#allocation2 + $0x4c] sm:$0xf0]  ;;  %v1044_v20 = vld [vmem:[#allocation2 + $0x44] sm:$0xf] }
  0x1a   :  { %v68_v7 = vadd.f32 %v1111_v3, %v67_v6  ;;  %352 = vmatpush.bf16.msra.mxu2 %v871_v49  ;;  %366 = vmatpush.bf16.msra.mxu3 %v875_v52  ;;  %v815_v21 = vor.u32 %v1046_v19, %v814_v18  ;;  %v816_v22 = vld [vmem:[#allocation2 + $0x50] sm:$0xf0]  ;;  %v822_v23 = vld [vmem:[#allocation2 + $0x48] sm:$0xf]  ;;  %v1047_v24 = vld [vmem:[#allocation2 + $0x54] sm:$0xf0] }
  0x1b   :  { %v819_v25 = vor.u32 %v1044_v20, %v816_v22  ;;  %v823_v26 = vor.u32 %v1047_v24, %v822_v23  ;;  %v1045_v27 = vld [vmem:[#allocation2 + $0x4c] sm:$0xf]  ;;  %v824_v28 = vld [vmem:[#allocation2 + $0x58] sm:$0xf0]  ;;  %v798_v30 = vld [vmem:[#allocation2 + $0x20] sm:$0xf] }
  0x1c   :  { %v1249_v8 = vsel %vm69_vm0, %v1111_v3, %v68_v7  ;;  %325 = vmatpush.bf16.msra.mxu0 %v847_v56  ;;  %v830_v3 = vld [vmem:[#allocation2 + $0x60] sm:$0xf]  ;;  %v832_v7 = vld [vmem:[#allocation2 + $0x70] sm:$0xf0]  ;;  %v827_v29 = vor.u32 %v1045_v27, %v824_v28  ;;  %v1042_v31 = vld [vmem:[#allocation2 + $0x2c] sm:$0xf0] }
  0x1d   :  { %339 = vmatpush.bf16.msra.mxu1 %v851_v60  ;;  %v831_v6 = vor.u32 %v1050_v4, %v830_v3  ;;  %v1040_v32 = vld [vmem:[#allocation2 + $0x24] sm:$0xf]  ;;  %v799_v33 = vor.u32 %v1042_v31, %v798_v30  ;;  %v800_v34 = vld [vmem:[#allocation2 + $0x30] sm:$0xf0]  ;;  %v806_v35 = vld [vmem:[#allocation2 + $0x28] sm:$0xf] }
  0x1e   :  { %353 = vmatpush.bf16.msra.mxu2 %v855_v61  ;;  %367 = vmatpush.bf16.msra.mxu3 %v859_v2  ;;  %v1043_v36 = vld [vmem:[#allocation2 + $0x34] sm:$0xf0]  ;;  %v803_v37 = vor.u32 %v1040_v32, %v800_v34  ;;  %v1041_v39 = vld [vmem:[#allocation2 + $0x2c] sm:$0xf]  ;;  %v808_v40 = vld [vmem:[#allocation2 + $0x38] sm:$0xf0] }
  0x1f   :  { %v807_v38 = vor.u32 %v1043_v36, %v806_v35  ;;  %v782_v41 = vld [vmem:[#allocation2] sm:$0xf]  ;;  %v811_v43 = vor.u32 %v1041_v39, %v808_v40  ;;  %v1038_v44 = vld [vmem:[#allocation2 + $0xc] sm:$0xf0]  ;;  %v1036_v45 = vld [vmem:[#allocation2 + $0x4] sm:$0xf] }
  0x20   :  { %326 = vmatpush.bf16.msra.mxu0 %v831_v6  ;;  %v784_v46 = vld [vmem:[#allocation2 + $0x10] sm:$0xf0]  ;;  %v783_v48 = vor.u32 %v1038_v44, %v782_v41  ;;  %v790_v50 = vld [vmem:[#allocation2 + $0x8] sm:$0xf]  ;;  %v1039_v51 = vld [vmem:[#allocation2 + $0x14] sm:$0xf0] }
  0x21   :  { %v787_v49 = vor.u32 %v1036_v45, %v784_v46  ;;  %v1037_v52 = vld [vmem:[#allocation2 + $0xc] sm:$0xf]  ;;  %v791_v53 = vor.u32 %v1039_v51, %v790_v50  ;;  %v792_v54 = vld [vmem:[#allocation2 + $0x18] sm:$0xf0]  ;;  %v1108_v18 = vld [vmem:[%s1323_s2] ss:$0 sm:$0xff] }
  0x22   :  { %v795_v56 = vor.u32 %v1037_v52, %v792_v54  ;;  %v1083_v23 = vld [vmem:[#allocation4 + $0x78] sm:$0xff]  ;;  %v1074_v24 = vld [vmem:[#allocation4 + $0x30] sm:$0xff]  ;;  %v1073_v27 = vld [vmem:[#allocation4 + $0x28] sm:$0xff] }
  0x23   :  { %v1081_v28 = vld [vmem:[#allocation4 + $0x68] sm:$0xff]  ;;  %v1098_v30 = vld [vmem:[#allocation4 + $0xf0] sm:$0xff]  ;;  %v1072_v31 = vld [vmem:[#allocation4 + $0x20] sm:$0xff] }
  0x24   :  { %327 = vmatpush.bf16.msra.mxu0 %v815_v21  ;;  %v1080_v32 = vld [vmem:[#allocation4 + $0x60] sm:$0xff]  ;;  %v1097_v34 = vld [vmem:[#allocation4 + $0xe8] sm:$0xff]  ;;  %v1071_v35 = vld [vmem:[#allocation4 + $0x18] sm:$0xff] }
  0x25   :  { %v1079_v36 = vld [vmem:[#allocation4 + $0x58] sm:$0xff]  ;;  %v1070_v39 = vld [vmem:[#allocation4 + $0x10] sm:$0xff]  ;;  %v1077_v44 = vld [vmem:[#allocation4 + $0x48] sm:$0xff] }
  0x26   :  { %v1078_v40 = vld [vmem:[#allocation4 + $0x50] sm:$0xff]  ;;  %v1087_v41 = vld [vmem:[#allocation4 + $0x98] sm:$0xff]  ;;  %v1276_v45 = vld [vmem:[%s1325_s4] sm:$0xf] }
  0x27   :  { %v1086_v46 = vld [vmem:[#allocation4 + $0x90] sm:$0xff]  ;;  %v154_v50 = vperm.slane %v1276_v45, 0  ;;  %v155_v51 = vperm.slane %v1276_v45, 1  ;;  %v1085_v52 = vld [vmem:[#allocation4 + $0x88] sm:$0xff] }
  0x28   :  { %328 = vmatpush.bf16.msra.mxu0 %v799_v33  ;;  %v1089_v33 = vld [vmem:[#allocation4 + $0xa8] sm:$0xff] }
  0x2c   :  { %329 = vmatpush.bf16.msra.mxu0 %v783_v48  ;;  %v1068_v48 = vld [vmem:[#allocation4] sm:$0xff] }
  0x80   :  { %v61_v9 = vpop.xlane.xlu0 %60 }
  0x81   :  { %v71_v10 = vmul.f32 %v1249_v8, %v61_v9  ;;  %v838_v9 = vld [vmem:[#allocation2 + $0x68] sm:$0xf] }
  0x83   :  { %v1253_v11 = vsub.f32 %v1240_v0, %v71_v10  ;;  %v1051_v10 = vld [vmem:[#allocation2 + $0x74] sm:$0xf0] }
  0x85   :  { %v75_v12 = vmul.f32 %v1253_v11, %v1253_v11 }
  0x87   :  { %77 = vadd.xlane.f32.xlu1 %v75_v12  ;;  %v835_v12 = vor.u32 %v1048_v5, %v832_v7 }
  0x88   :  { %v63_v13 = vpop.xlane.xlu0 %62 }
  0x89   :  { %v72_v14 = vmul.f32 %v1249_v8, %v63_v13  ;;  %v839_v13 = vor.u32 %v1051_v10, %v838_v9  ;;  %340 = vmatpush.bf16.msra.mxu1 %v835_v12  ;;  %v1107_v12 = vld [vmem:[%s1322_s1] ss:$0 sm:$0xff] }
  0x8b   :  { %v1259_v15 = vsub.f32 %v1246_v1, %v72_v14  ;;  %v1049_v14 = vld [vmem:[#allocation2 + $0x6c] sm:$0xf]  ;;  %354 = vmatpush.bf16.msra.mxu2 %v839_v13 }
  0x8d   :  { %v76_v16 = vmul.f32 %v1259_v15, %v1259_v15  ;;  %341 = vmatpush.bf16.msra.mxu1 %v819_v25  ;;  %v1082_v25 = vld [vmem:[#allocation4 + $0x70] sm:$0xff] }
  0x8f   :  { %79 = vadd.xlane.f32.xlu1 %v76_v16  ;;  %v840_v16 = vld [vmem:[#allocation2 + $0x78] sm:$0xf0]  ;;  %355 = vmatpush.bf16.msra.mxu2 %v823_v26 }
  0x90   :  { %v843_v17 = vor.u32 %v1049_v14, %v840_v16  ;;  %v1099_v26 = vld [vmem:[#allocation4 + $0xf8] sm:$0xff] }
  0x91   :  { %342 = vmatpush.bf16.msra.mxu1 %v803_v37  ;;  %v1088_v37 = vld [vmem:[#allocation4 + $0xa0] sm:$0xff] }
  0x92   :  { %368 = vmatpush.bf16.msra.mxu3 %v843_v17 }
  0x93   :  { %356 = vmatpush.bf16.msra.mxu2 %v807_v38  ;;  %v1096_v38 = vld [vmem:[#allocation4 + $0xe0] sm:$0xff] }
  0x95   :  { %343 = vmatpush.bf16.msra.mxu1 %v787_v49  ;;  %v1076_v49 = vld [vmem:[#allocation4 + $0x40] sm:$0xff] }
  0x96   :  { %369 = vmatpush.bf16.msra.mxu3 %v827_v29  ;;  %v1090_v29 = vld [vmem:[#allocation4 + $0xb0] sm:$0xff] }
  0x97   :  { %357 = vmatpush.bf16.msra.mxu2 %v791_v53  ;;  %v1093_v53 = vld [vmem:[#allocation4 + $0xc8] sm:$0xff] }
  0x99   :  { %728 = vmatpush.bf16.msrb.mxu1 %v1083_v23 }
  0x9a   :  { %370 = vmatpush.bf16.msra.mxu3 %v811_v43  ;;  %v1069_v43 = vld [vmem:[#allocation4 + $0x8] sm:$0xff] }
  0x9d   :  { %729 = vmatpush.bf16.msrb.mxu1 %v1082_v25 }
  0x9e   :  { %371 = vmatpush.bf16.msra.mxu3 %v795_v56 }
  0xa1   :  { %730 = vmatpush.bf16.msrb.mxu1 %v1081_v28 }
  0xa2   :  { %756 = vmatpush.bf16.msrb.mxu3 %v1099_v26 }
  0xa5   :  { %731 = vmatpush.bf16.msrb.mxu1 %v1080_v32 }
  0xa6   :  { %757 = vmatpush.bf16.msrb.mxu3 %v1098_v30 }
  0xa9   :  { %732 = vmatpush.bf16.msrb.mxu1 %v1079_v36 }
  0xaa   :  { %758 = vmatpush.bf16.msrb.mxu3 %v1097_v34 }
  0xad   :  { %733 = vmatpush.bf16.msrb.mxu1 %v1078_v40 }
  0xae   :  { %759 = vmatpush.bf16.msrb.mxu3 %v1096_v38 }
  0xb1   :  { %734 = vmatpush.bf16.msrb.mxu1 %v1077_v44 }
  0xb5   :  { %735 = vmatpush.bf16.msrb.mxu1 %v1076_v49 }
  0xfa   :  { %v78_v42 = vpop.xlane.xlu1 %77 }
  0xfb   :  { %v81_v47 = vmul.f32 %v78_v42, %v1249_v8  ;;  %v1095_v42 = vld [vmem:[#allocation4 + $0xd8] sm:$0xff] }
  0xfc   :  { %760 = vmatpush.bf16.msrb.mxu3 %v1095_v42 }
  0xfd   :  { %v83_v55 = vadd.f32 1e-05, %v81_v47  ;;  %v1094_v47 = vld [vmem:[#allocation4 + $0xd0] sm:$0xff] }
  0xff   :  { %1112 = vrsqrt.f32 %v83_v55  ;;  %vm91_vm2 = vweird.f32 %v83_v55 }
 0x100   :  { %761 = vmatpush.bf16.msrb.mxu3 %v1094_v47 }
 0x102   :  { %v80_v57 = vpop.xlane.xlu1 %79 }
 0x103   :  { %v82_v58 = vmul.f32 %v80_v57, %v1249_v8 }
 0x104   :  { %762 = vmatpush.bf16.msrb.mxu3 %v1093_v53 }
 0x105   :  { %v1113_v59 = vpop.eup %1112  ;;  %v84_v60 = vadd.f32 1e-05, %v82_v58 }
 0x106   :  { %v86_v61 = vmul.f32 %v1113_v59, %v83_v55  ;;  %vm92_vm1 = vweird.f32 %v1113_v59 }
 0x107   :  { %1114 = vrsqrt.f32 %v84_v60  ;;  %vm93_vm3 = vmor %vm91_vm2, %vm92_vm1  ;;  %vm101_vm5 = vweird.f32 %v84_v60 }
 0x108   :  { %v87_v62 = vmul.f32 %v1113_v59, %v86_v61  ;;  %v157_v61 = vperm.slane %v1276_v45, 3 }
 0x10a   :  { %v88_v63 = vmul.f32 0.5, %v87_v62  ;;  %v1084_v62 = vld [vmem:[#allocation4 + $0x80] sm:$0xff] }
 0x10c   :  { %v89_v2 = vsub.f32 1.5, %v88_v63  ;;  %v1092_v63 = vld [vmem:[#allocation4 + $0xc0] sm:$0xff] }
 0x10d   :  { %v1115_v3 = vpop.eup %1114  ;;  %763 = vmatpush.bf16.msrb.mxu3 %v1092_v63 }
 0x10e   :  { %v90_v4 = vmul.f32 %v1113_v59, %v89_v2  ;;  %v96_v5 = vmul.f32 %v1115_v3, %v84_v60  ;;  %vm102_vm4 = vweird.f32 %v1115_v3  ;;  %v156_v60 = vperm.slane %v1276_v45, 2 }
 0x10f   :  { %vm103_vm6 = vmor %vm101_vm5, %vm102_vm4 }
 0x110   :  { %v97_v6 = vmul.f32 %v1115_v3, %v96_v5  ;;  %v94_v7 = vsel %vm93_vm3, %v1113_v59, %v90_v4 }
 0x111   :  { %v105_v8 = vmul.f32 %v94_v7, %v1253_v11  ;;  %v1075_v11 = vld [vmem:[#allocation4 + $0x38] sm:$0xff] }
 0x112   :  { %v98_v9 = vmul.f32 0.5, %v97_v6  ;;  %714 = vmatpush.bf16.msrb.mxu0 %v1075_v11 }
 0x113   :  { %v111_v17 = vmul.f32 %v1107_v12, %v105_v8 }
 0x114   :  { %v99_v10 = vsub.f32 1.5, %v98_v9 }
 0x115   :  { %v117_v20 = vadd.f32 %v1108_v18, %v111_v17 }
 0x116   :  { %v100_v13 = vmul.f32 %v1115_v3, %v99_v10  ;;  %715 = vmatpush.bf16.msrb.mxu0 %v1074_v24 }
 0x118   :  { %v104_v14 = vsel %vm103_vm6, %v1115_v3, %v100_v13 }
 0x119   :  { %v106_v16 = vmul.f32 %v104_v14, %v1259_v15  ;;  %v1091_v15 = vld [vmem:[#allocation4 + $0xb8] sm:$0xff] }
 0x11a   :  { %742 = vmatpush.bf16.msrb.mxu2 %v1091_v15  ;;  %716 = vmatpush.bf16.msrb.mxu0 %v1073_v27 }
 0x11b   :  { %v112_v19 = vmul.f32 %v1107_v12, %v106_v16 }
 0x11d   :  { %v118_v21 = vadd.f32 %v1108_v18, %v112_v19 }
 0x11e   :  { %743 = vmatpush.bf16.msrb.mxu2 %v1090_v29  ;;  %717 = vmatpush.bf16.msrb.mxu0 %v1072_v31 }
 0x11f   :  { %v119_v22 = vpack.c.bf16 %v118_v21, %v117_v20 }
 0x121   :  { %330 = vmatmul.bf16.vlgmr.msra.gmra.mxu0 %v119_v22  ;;  %344 = vmatmul.bf16.vlgmr.msra.gmra.mxu1 %v119_v22 }
 0x122   :  { %358 = vmatmul.bf16.vlgmr.msra.gmra.mxu2 %v119_v22  ;;  %372 = vmatmul.bf16.vlgmr.msra.gmra.mxu3 %v119_v22 }
 0x123   :  { %744 = vmatpush.bf16.msrb.mxu2 %v1089_v33  ;;  %718 = vmatpush.bf16.msrb.mxu0 %v1071_v35 }
 0x127   :  { %745 = vmatpush.bf16.msrb.mxu2 %v1088_v37  ;;  %719 = vmatpush.bf16.msrb.mxu0 %v1070_v39 }
 0x12b   :  { %746 = vmatpush.bf16.msrb.mxu2 %v1087_v41  ;;  %720 = vmatpush.bf16.msrb.mxu0 %v1069_v43 }
 0x12f   :  { %747 = vmatpush.bf16.msrb.mxu2 %v1086_v46  ;;  %721 = vmatpush.bf16.msrb.mxu0 %v1068_v48 }
 0x133   :  { %748 = vmatpush.bf16.msrb.mxu2 %v1085_v52 }
 0x137   :  { %749 = vmatpush.bf16.msrb.mxu2 %v1084_v62 }
 0x19e   :  { %v331_v54 = vpop.f32.mrf.mxu0  ;;  %v345_v55 = vpop.f32.mrf.mxu1 }
 0x19f   :  { %v1280_v56 = vadd.f32 %v331_v54, %v154_v50  ;;  %v1282_v57 = vadd.f32 %v345_v55, %v155_v51 }
 0x1a1   :  { %v386_v58 = vmul.f32 0.044715, %v1280_v56  ;;  %v387_v59 = vmul.f32 0.044715, %v1282_v57  ;;  %v379_v63 = vmul.f32 0.5, %v1282_v57 }
 0x1a3   :  { %v394_v2 = vmul.f32 %v386_v58, %v1280_v56  ;;  %v395_v3 = vmul.f32 %v387_v59, %v1282_v57 }
 0x1a5   :  { %v359_v4 = vpop.f32.mrf.mxu2  ;;  %v373_v5 = vpop.f32.mrf.mxu3  ;;  %v402_v6 = vmul.f32 %v394_v2, %v1280_v56  ;;  %v403_v7 = vmul.f32 %v395_v3, %v1282_v57 }
 0x1a6   :  { %v1292_v9 = vadd.f32 %v359_v4, %v156_v60  ;;  %v1294_v10 = vadd.f32 %v373_v5, %v157_v61  ;;  %v333_v8 = vpop.f32.mrf.mxu0  ;;  %v347_v12 = vpop.f32.mrf.mxu1 }
 0x1a7   :  { %v334_v13 = vadd.f32 %v333_v8, %v154_v50  ;;  %v348_v14 = vadd.f32 %v347_v12, %v155_v51  ;;  %v410_v16 = vadd.f32 %v402_v6, %v1280_v56  ;;  %v411_v19 = vadd.f32 %v403_v7, %v1282_v57 }
 0x1a8   :  { %v388_v17 = vmul.f32 0.044715, %v1292_v9  ;;  %v389_v18 = vmul.f32 0.044715, %v1294_v10 }
 0x1a9   :  { %v390_v20 = vmul.f32 0.044715, %v334_v13  ;;  %v391_v21 = vmul.f32 0.044715, %v348_v14  ;;  %v418_v25 = vmul.f32 0.7978846, %v410_v16 }
 0x1aa   :  { %v396_v22 = vmul.f32 %v388_v17, %v1292_v9  ;;  %v397_v11 = vmul.f32 %v389_v18, %v1294_v10  ;;  %v419_v15 = vmul.f32 0.7978846, %v411_v19  ;;  %v383_v2 = vmul.f32 0.5, %v348_v14 }
 0x1ab   :  { %v398_v23 = vmul.f32 %v390_v20, %v334_v13  ;;  %v399_v24 = vmul.f32 %v391_v21, %v348_v14  ;;  %1116 = vtanh.f32 %v418_v25  ;;  %v380_v20 = vmul.f32 0.5, %v1292_v9 }
 0x1ac   :  { %v404_v26 = vmul.f32 %v396_v22, %v1292_v9  ;;  %v405_v27 = vmul.f32 %v397_v11, %v1294_v10  ;;  %1118 = vtanh.f32 %v419_v15  ;;  %v381_v21 = vmul.f32 0.5, %v1294_v10 }
 0x1ad   :  { %v361_v28 = vpop.f32.mrf.mxu2  ;;  %v375_v29 = vpop.f32.mrf.mxu3  ;;  %v406_v30 = vmul.f32 %v398_v23, %v334_v13  ;;  %v407_v31 = vmul.f32 %v399_v24, %v348_v14 }
 0x1ae   :  { %v362_v32 = vadd.f32 %v361_v28, %v156_v60  ;;  %v376_v33 = vadd.f32 %v375_v29, %v157_v61  ;;  %v412_v34 = vadd.f32 %v404_v26, %v1292_v9  ;;  %v413_v37 = vadd.f32 %v405_v27, %v1294_v10  ;;  %v1109_v29 = vld [vmem:[%s1327_s6] ss:$0 sm:$0xff] }
 0x1af   :  { %v414_v35 = vadd.f32 %v406_v30, %v334_v13  ;;  %v415_v36 = vadd.f32 %v407_v31, %v348_v14  ;;  %v378_v60 = vmul.f32 0.5, %v1280_v56  ;;  %v382_v61 = vmul.f32 0.5, %v334_v13 }
 0x1b0   :  { %v392_v38 = vmul.f32 0.044715, %v362_v32  ;;  %v393_v39 = vmul.f32 0.044715, %v376_v33  ;;  %v420_v44 = vmul.f32 0.7978846, %v412_v34 }
 0x1b1   :  { %v422_v40 = vmul.f32 0.7978846, %v414_v35  ;;  %v423_v41 = vmul.f32 0.7978846, %v415_v36  ;;  %v421_v45 = vmul.f32 0.7978846, %v413_v37  ;;  %v1117_v48 = vpop.eup %1116 }
 0x1b2   :  { %v400_v42 = vmul.f32 %v392_v38, %v362_v32  ;;  %v401_v43 = vmul.f32 %v393_v39, %v376_v33  ;;  %v1119_v49 = vpop.eup %1118  ;;  %v434_v52 = vadd.f32 1.0, %v1117_v48  ;;  %v384_v57 = vmul.f32 0.5, %v362_v32 }
 0x1b3   :  { %1120 = vtanh.f32 %v422_v40  ;;  %v435_v58 = vadd.f32 1.0, %v1119_v49  ;;  %v385_v22 = vmul.f32 0.5, %v376_v33 }
 0x1b4   :  { %1122 = vtanh.f32 %v423_v41  ;;  %v408_v46 = vmul.f32 %v400_v42, %v362_v32  ;;  %v409_v47 = vmul.f32 %v401_v43, %v376_v33  ;;  %v442_v5 = vmul.f32 %v434_v52, %v378_v60 }
 0x1b5   :  { %1124 = vtanh.f32 %v420_v44  ;;  %v443_v8 = vmul.f32 %v435_v58, %v379_v63 }
 0x1b6   :  { %v416_v50 = vadd.f32 %v408_v46, %v362_v32  ;;  %v417_v51 = vadd.f32 %v409_v47, %v376_v33  ;;  %1126 = vtanh.f32 %v421_v45 }
 0x1b8   :  { %v424_v53 = vmul.f32 0.7978846, %v416_v50  ;;  %v425_v54 = vmul.f32 0.7978846, %v417_v51 }
 0x1b9   :  { %v1121_v55 = vpop.eup %1120 }
 0x1ba   :  { %v1123_v59 = vpop.eup %1122  ;;  %v438_v62 = vadd.f32 1.0, %v1121_v55  ;;  %1128 = vtanh.f32 %v424_v53 }
 0x1bb   :  { %v439_v3 = vadd.f32 1.0, %v1123_v59  ;;  %1130 = vtanh.f32 %v425_v54  ;;  %v1125_v4 = vpop.eup %1124 }
 0x1bc   :  { %v446_v6 = vmul.f32 %v438_v62, %v382_v61  ;;  %v1127_v7 = vpop.eup %1126  ;;  %v436_v18 = vadd.f32 1.0, %v1125_v4 }
 0x1bd   :  { %v447_v12 = vmul.f32 %v439_v3, %v383_v2  ;;  %v437_v56 = vadd.f32 1.0, %v1127_v7 }
 0x1be   :  { %v450_v16 = vpack.c.bf16 %v446_v6, %v442_v5  ;;  %v444_v23 = vmul.f32 %v436_v18, %v380_v20 }
 0x1bf   :  { %v451_v17 = vpack.c.bf16 %v447_v12, %v443_v8  ;;  %v445_v25 = vmul.f32 %v437_v56, %v381_v21 }
 0x1c0   :  { %v1129_v19 = vpop.eup %1128  ;;  %722 = vmatmul.bf16.vlgmr.msrb.gmra.mxu0 %v450_v16 }
 0x1c1   :  { %v1131_v13 = vpop.eup %1130  ;;  %736 = vmatmul.bf16.vlgmr.msrb.gmra.mxu1 %v451_v17  ;;  %v440_v14 = vadd.f32 1.0, %v1129_v19 }
 0x1c2   :  { %v441_v11 = vadd.f32 1.0, %v1131_v13 }
 0x1c3   :  { %v448_v24 = vmul.f32 %v440_v14, %v384_v57 }
 0x1c4   :  { %v449_v15 = vmul.f32 %v441_v11, %v385_v22 }
 0x1c5   :  { %v452_v26 = vpack.c.bf16 %v448_v24, %v444_v23 }
 0x1c6   :  { %v453_v27 = vpack.c.bf16 %v449_v15, %v445_v25 }
 0x1c7   :  { %750 = vmatmul.bf16.vlgmr.msrb.gmra.mxu2 %v452_v26 }
 0x1c8   :  { %764 = vmatmul.bf16.vlgmr.msrb.gmra.mxu3 %v453_v27 }
 0x23d   :  { %v723_v28 = vpop.f32.mrf.mxu0 }
 0x23e   :  { %v724_v9 = vadd.f32 %v1109_v29, %v723_v28  ;;  %v737_v30 = vpop.f32.mrf.mxu1 }
 0x240   :  { %v738_v31 = vadd.f32 %v737_v30, %v724_v9 }
 0x245   :  { %v725_v32 = vpop.f32.mrf.mxu0 }
 0x246   :  { %v726_v35 = vadd.f32 %v1109_v29, %v725_v32  ;;  %v739_v38 = vpop.f32.mrf.mxu1 }
 0x248   :  { %v740_v39 = vadd.f32 %v739_v38, %v726_v35 }
 0x24a   :  { %v751_v10 = vpop.f32.mrf.mxu2 }
 0x24b   :  { %v752_v33 = vadd.f32 %v751_v10, %v738_v31  ;;  %v765_v34 = vpop.f32.mrf.mxu3 }
 0x24d   :  { %v766_v36 = vadd.f32 %v765_v34, %v752_v33 }
 0x24f   :  { %v770_v37 = vadd.f32 %v766_v36, %v1240_v0 }
 0x251   :  { %772 = vst [vmem:[%s1328_s7] sm:$0xff] %v770_v37 }
 0x252   :  { %v753_v40 = vpop.f32.mrf.mxu2 }
 0x253   :  { %v754_v41 = vadd.f32 %v753_v40, %v740_v39  ;;  %v767_v42 = vpop.f32.mrf.mxu3 }
 0x255   :  { %v768_v43 = vadd.f32 %v767_v42, %v754_v41 }
 0x257   :  { %v771_v44 = vadd.f32 %v768_v43, %v1246_v1 }
 0x259   :  { %773 = vst [vmem:[%s1328_s7 + $0x8] sm:$0xff] %v771_v44 }
 0x25a   :  { %778 = vsyncpa [#allocation3], 1 }
 0x25b   :  { %779 = vsyncpa [#allocation5], 1 }

// kernel: forward.15
= control target key start
LH: loop header
LB: loop body
LE: loop exit
PB: predicated region body
PF: predicated region fallthrough
CT: control target
= control target key end

     0   :  { %s395_s20 = smov 0   ;;  %s428_s0 = inlined_call_operand.vmem [shape: f32[2,8,128], index: 0, kind: input, shape index: {}]   ;;  %s429_s1 = inlined_call_operand.vmem [shape: f32[1,128], index: 1, kind: input, shape index: {}]   ;;  %s430_s2 = inlined_call_operand.vmem [shape: f32[1,128], index: 2, kind: input, shape index: {}]   ;;  %s431_s3 = inlined_call_operand.vmem [shape: f32[1,128], index: 3, kind: input, shape index: {}]   ;;  %s432_s4 = inlined_call_operand.<no memory space> [shape: f32[1,1], index: 4, kind: input, shape index: {}]   ;;  %s433_s5 = inlined_call_operand.vmem [shape: f32[2,8,1], index: 5, kind: output, shape index: {}]  }
   0x1   :  { %v10_v0 = vstv %s432_s4 }
   0x2   :  { %11 = vst [vmem:[#allocation2] sm:$0x1] %v10_v0 }
   0x3 LB: > { %s327_s21 = sadd.s32 4294967295, %s359_s20   ;;  %p331_p0 = scmp.ge.s32.totalorder %s359_s20, 1  ;;  %s359_s20 = sphi %s395_s20, %s17_s20  }
   0x4   : > { %p188_p1 = scmp.lt.s32.totalorder %s359_s20, 3 }
   0x6   : > { %p189_p2 = pnand %p331_p0, %p188_p1 }
   0x7   : > { %p214_p3 = scmp.lt.s32.totalorder (!%p189_p2), %s327_s21, 1 }
   0x8   : > { %192 = sbr.rel (%p189_p2) target bundleno = 404 (0x194), region = 40 }
   0xd   : > { %s435_s21 = smov (!%p214_p3, %s327_s21), 1  ;;  %v361_v2 = vmov 128.0   ;;  %v345_v22 = vld [vmem:[%s429_s1] ss:$0 sm:$0xff]  ;;  %vm272_vm4 = vcmask 7168  }
   0xe   : > { %s332_s4 = sshll.u32 %s435_s21, 3  ;;  %349 = vrcp.f32 %v361_v2  ;;  %v346_v25 = vld [vmem:[%s430_s2] ss:$0 sm:$0xff] }
   0xf   : > { %s217_s24 = scalar_lea.vmem %s428_s0, %s332_s4  ;;  %v347_v27 = vld [vmem:[%s431_s3] ss:$0 sm:$0xff]  ;;  %s221_s8 = scalar_lea.vmem %s433_s5, %s332_s4 }
  0x10   : > { %v222_v1 = vld [vmem:[%s217_s24] sm:$0xff] }
  0x11   : > { %223 = vadd.xlane.f32.xlu0 %v222_v1  ;;  %v348_v30 = vld [vmem:[#allocation2] ss:$0 sm:$0xff] }
  0x14   : > { %v350_v3 = vpop.eup %349 }
  0x15   : > { %v226_v4 = vmul.f32 128.0, %v350_v3  ;;  %vm230_vm0 = vweird.f32 %v350_v3 }
  0x17   : > { %v227_v5 = vsub.f32 1.0, %v226_v4 }
  0x19   : > { %v228_v6 = vmul.f32 %v350_v3, %v227_v5 }
  0x1b   : > { %v229_v7 = vadd.f32 %v350_v3, %v228_v6 }
  0x1d   : > { %v231_v8 = vsel %vm230_vm0, %v350_v3, %v229_v7 }
  0x84   : > { %v224_v9 = vpop.xlane.xlu0 %223 }
  0x85   : > { %v232_v10 = vmul.f32 %v231_v8, %v224_v9 }
  0x87   : > { %v233_v11 = vsub.f32 %v222_v1, %v232_v10 }
  0x89   : > { %v234_v12 = vmul.f32 %v233_v11, %v233_v11 }
  0x8b   : > { %235 = vadd.xlane.f32.xlu0 %v234_v12 }
  0xfe   : > { %v236_v13 = vpop.xlane.xlu0 %235 }
  0xff   : > { %v237_v14 = vmul.f32 %v236_v13, %v231_v8 }
 0x101   : > { %v238_v15 = vadd.f32 1e-05, %v237_v14 }
 0x103   : > { %351 = vrsqrt.f32 %v238_v15  ;;  %vm245_vm2 = vweird.f32 %v238_v15 }
 0x109   : > { %v352_v16 = vpop.eup %351 }
 0x10a   : > { %v240_v17 = vmul.f32 %v352_v16, %v238_v15  ;;  %vm246_vm1 = vweird.f32 %v352_v16 }
 0x10b   : > { %vm247_vm3 = vmor %vm245_vm2, %vm246_vm1 }
 0x10c   : > { %v241_v18 = vmul.f32 %v352_v16, %v240_v17 }
 0x10e   : > { %v242_v19 = vmul.f32 0.5, %v241_v18 }
 0x110   : > { %v243_v20 = vsub.f32 1.5, %v242_v19 }
 0x112   : > { %v244_v21 = vmul.f32 %v352_v16, %v243_v20 }
 0x114   : > { %v248_v23 = vsel %vm247_vm3, %v352_v16, %v244_v21 }
 0x115   : > { %v249_v24 = vmul.f32 %v248_v23, %v233_v11 }
 0x117   : > { %v254_v26 = vmul.f32 %v345_v22, %v249_v24 }
 0x119   : > { %v259_v28 = vadd.f32 %v346_v25, %v254_v26 }
 0x11b   : > { %v264_v29 = vmul.f32 %v347_v27, %v259_v28 }
 0x11d   : > { %265 = vadd.xlane.f32.xlu1 %v264_v29 }
 0x190   : > { %v266_v31 = vpop.xlane.xlu1 %265 }
 0x191   : > { %v271_v32 = vadd.f32 %v348_v30, %v266_v31 }
 0x193   : > { %273 = vst.msk [vmem:[%s221_s8] sm:$0xff] %vm272_vm4, %v271_v32 }
 0x194 PF: > { %s17_s20 = sadd.s32 1, %s359_s20  }
 0x195   : > { %p14_p4 = scmp.ge.s32.totalorder %s17_s20, 4  }
 0x197   :  { %16 = sbr.rel (!%p14_p4) target bundleno = 3 (0x3), region = 70 }

</bundles_post_ra>
